<compile_context>
chip_gen: v5e
topology: v5e:2x2
jax: 0.10.0
libtpu: 0.0.40
codegen_flags: <defaults>
</compile_context>

<pallas_src>
import functools

import jax
import jax.numpy as jnp
from jax.experimental import pallas as pl
from jax.experimental.pallas import tpu as pltpu


def _pick_batch_block(n, bytes_per_sample, max_block, vmem_budget_bytes=8 * 1024 * 1024):
    """Largest per-step batch block that divides n, fits the VMEM budget and max_block."""
    cap = max(1, min(max_block, vmem_budget_bytes // max(1, bytes_per_sample)))
    if n <= cap:
        return n
    best = 1
    for b in range(min(n, cap), 0, -1):
        if n % b == 0:
            if b % 8 == 0:          # prefer clean sublane tiling for the pooled output
                return b
            if best == 1:
                best = b
    return best


def _avg_pool_kernel(x_ref, o_ref):
    # x_ref: (B_blk, C, HW) f32  -- NCHW view with spatial flattened (no transpose).
    # o_ref: (B_blk, C)     f32  -- spatial mean per channel (lane-dense output).
    o_ref[...] = jnp.mean(x_ref[...], axis=-1)


def _max_pool_kernel(x_ref, wc_ref, bc_ref, o_ref, *, b_blk):
    # x_ref : (B_blk, C_in, HW) f32
    # wc_ref: (C_out, C_in)     bf16  (1x1 conv weight, MXU input)
    # bc_ref: (C_out, 1)        f32
    # o_ref : (C_out, B_blk)    f32   = max_HW(conv1x1(x)) + conv bias (transposed;
    #                                   tiny, wrapper transposes it back).  Keeping the
    #                                   channel axis on sublanes keeps every in-kernel op
    #                                   on plain, fully-supported lowering paths; the
    #                                   narrow store is ~1.5% of the streamed input bytes.
    for b in range(b_blk):  # static unroll over the per-step batch block
        xb = x_ref[b].astype(jnp.bfloat16)                                  # (C_in, HW)
        y = jnp.dot(wc_ref[...], xb, preferred_element_type=jnp.float32)    # (C_out, HW)
        # conv bias is constant across spatial positions -> adding after max is exact.
        o_ref[:, b:b + 1] = jnp.max(y, axis=-1, keepdims=True) + bc_ref[...]


def custom_simple_net_forward(x_nchw, conv_w, conv_b, fc_w, fc_b, *, pool_type="avg"):
    """Forward pass of CustomSimpleNet.

    x_nchw : (N, C, H, W) f32   conv_w : (C_out, C_in, 1, 1)   conv_b : (C_out,)
    fc_w   : (2, C_out)         fc_b   : (2,)
    returns: (N, 2) f32
    """
    N, C, H, W = x_nchw.shape
    C_out = conv_w.shape[0]
    HW = H * W

    # Free contiguous view (unlike an NCHW->NHWC transpose, which is a full HBM pass).
    x3 = x_nchw.reshape(N, C, HW)
    w2d = conv_w.reshape(C_out, C)                      # (C_out, C_in)

    cparams = pltpu.CompilerParams(dimension_semantics=("parallel",))

    if pool_type == "avg":
        b_blk = _pick_batch_block(N, C * HW * 4, max_block=512)
        pooled = pl.pallas_call(
            _avg_pool_kernel,
            out_shape=jax.ShapeDtypeStruct((N, C), jnp.float32),
            grid_spec=pltpu.PrefetchScalarGridSpec(
                num_scalar_prefetch=0,
                grid=(N // b_blk,),
                in_specs=[pl.BlockSpec((b_blk, C, HW), lambda n: (n, 0, 0))],
                out_specs=pl.BlockSpec((b_blk, C), lambda n: (n, 0)),
            ),
            compiler_params=cparams,
        )(x3)
        # avg-pool commutes with conv1x1 and fc: fuse them into one (C_in, 2) matrix
        # and a 2-vector (conv bias folded in), applied to the pooled features.
        w_fused = w2d.T @ fc_w.T                        # (C_in, 2)
        b_fused = conv_b @ fc_w.T + fc_b                # (2,)
        return pooled @ w_fused + b_fused

    elif pool_type == "max":
        b_blk = _pick_batch_block(N, C * HW * 4, max_block=16)  # static unroll cap
        wc = w2d.astype(jnp.bfloat16)                   # tiny; bf16 MXU input
        bc = conv_b.reshape(C_out, 1).astype(jnp.float32)
        pooled_t = pl.pallas_call(
            functools.partial(_max_pool_kernel, b_blk=b_blk),
            out_shape=jax.ShapeDtypeStruct((C_out, N), jnp.float32),
            grid_spec=pltpu.PrefetchScalarGridSpec(
                num_scalar_prefetch=0,
                grid=(N // b_blk,),
                in_specs=[
                    pl.BlockSpec((b_blk, C, HW), lambda n: (n, 0, 0)),
                    pl.BlockSpec((C_out, C), lambda n: (0, 0)),
                    pl.BlockSpec((C_out, 1), lambda n: (0, 0)),
                ],
                out_specs=pl.BlockSpec((C_out, b_blk), lambda n: (0, n)),
            ),
            compiler_params=cparams,
        )(x3, wc, bc)
        pooled = pooled_t.T                             # (N, C_out), negligible bytes
        return pooled @ fc_w.T + fc_b

    else:
        raise ValueError(pool_type)


if __name__ == "__main__":
    # Small shapes consistent with the module (in_channels is a ctor parameter).
    N, C, H, W = 2, 256, 8, 8

    key = jax.random.PRNGKey(0)
    k1, k2, k3, k4, k5 = jax.random.split(key, 5)

    x = jax.random.normal(k1, (N, C, H, W), dtype=jnp.float32)

    # Deterministic, PyTorch-default-like uniform init (bound = 1/sqrt(fan_in)).
    bound = 1.0 / (C ** 0.5)
    conv_w = jax.random.uniform(k2, (C, C, 1, 1), jnp.float32, -bound, bound)
    conv_b = jax.random.uniform(k3, (C,), jnp.float32, -bound, bound)
    fc_w = jax.random.uniform(k4, (2, C), jnp.float32, -bound, bound)
    fc_b = jax.random.uniform(k5, (2,), jnp.float32, -bound, bound)

    out_avg = jax.block_until_ready(
        custom_simple_net_forward(x, conv_w, conv_b, fc_w, fc_b, pool_type="avg"))
    out_max = jax.block_until_ready(
        custom_simple_net_forward(x, conv_w, conv_b, fc_w, fc_b, pool_type="max"))

    # Pure-JAX reference of the PyTorch forward (conv1x1 -> global pool -> fc).
    xr = x.reshape(N, C, H * W)
    y_ref = jnp.einsum("nch,oc->noh", xr, conv_w.reshape(C, C)) + conv_b[None, :, None]
    avg_ref = jnp.mean(y_ref, axis=-1) @ fc_w.T + fc_b
    max_ref = jnp.max(y_ref, axis=-1) @ fc_w.T + fc_b

    assert out_avg.shape == (N, 2) and out_max.shape == (N, 2)
    assert jnp.allclose(out_avg, avg_ref, atol=1e-3, rtol=1e-3), (out_avg, avg_ref)
    # max path uses bf16 MXU inputs with f32 accumulation -> looser tolerance.
    assert jnp.allclose(out_max, max_ref, atol=3e-2, rtol=3e-2), (out_max, max_ref)
    print("KERNEL_OK")
</pallas_src>

<mosaic_0001>
module attributes {stable_mosaic.version = 11 : i64} {
  func.func @_avg_pool_kernel(%arg0: i32, %arg1: memref<2x256x64xf32, #tpu.memory_space<vmem>>, %arg2: memref<2x256xf32, #tpu.memory_space<vmem>>) attributes {dimension_semantics = [#tpu.dimension_semantics<parallel>], iteration_bounds = array<i64: 1>, scalar_prefetch = 0 : i64, scratch_operands = 0 : i64, tpu.core_type = #tpu.core_type<tc>, window_params = [{transform_indices = @transform_0, window_bounds = array<i64: 2, 256, 64>}, {transform_indices = @transform_1, window_bounds = array<i64: 2, 256>}]} {
    %c0 = arith.constant 0 : index
    %c0_0 = arith.constant 0 : index
    %c0_1 = arith.constant 0 : index
    %0 = vector.load %arg1[%c0, %c0_0, %c0_1] : memref<2x256x64xf32, #tpu.memory_space<vmem>>, vector<2x256x64xf32>
    %cst = arith.constant dense<0.000000e+00> : vector<2x256xf32>
    %1 = vector.multi_reduction <add>, %0, %cst [2] : vector<2x256x64xf32> to vector<2x256xf32>
    %cst_2 = arith.constant 6.400000e+01 : f32
    %2 = vector.broadcast %cst_2 : f32 to vector<2x256xf32>
    %3 = arith.divf %1, %2 : vector<2x256xf32>
    %c0_3 = arith.constant 0 : index
    %c0_4 = arith.constant 0 : index
    %4 = vector.load %arg2[%c0_3, %c0_4] : memref<2x256xf32, #tpu.memory_space<vmem>>, vector<2x256xf32>
    tpu.vector_store %arg2[%c0_3, %c0_4], %3 {strides = array<i32>} : memref<2x256xf32, #tpu.memory_space<vmem>>, vector<2x256xf32>,
    return
  }
  func.func @transform_0(%arg0: i32) -> (i32, i32, i32) {
    %c0_i32 = arith.constant 0 : i32
    %c0_i32_0 = arith.constant 0 : i32
    %c0_i32_1 = arith.constant 0 : i32
    return %arg0, %c0_i32, %c0_i32_0 : i32, i32, i32
  }
  func.func @transform_1(%arg0: i32) -> (i32, i32) {
    %c0_i32 = arith.constant 0 : i32
    %c0_i32_0 = arith.constant 0 : i32
    return %arg0, %c0_i32 : i32, i32
  }
}

</mosaic_0001>

<bundles_post_ra>
// kernel: tpu_custom_call.1
= control target key start
LH: loop header
LB: loop body
LE: loop exit
PB: predicated region body
PF: predicated region fallthrough
CT: control target
= control target key end

     0   :  { %vm73_vm0 = vcmask 523264   ;;  %s3115_s0 = inlined_call_operand.vmem [shape: f32[2,256,64], index: 0, kind: input, shape index: {}]   ;;  %s3116_s1 = inlined_call_operand.hbm [shape: f32[2,256], index: 1, kind: output, shape index: {}]  }
   0x1   :  { %v13_v0 = vld [vmem:[%s3115_s0 + $0x20] sm:$0xff]  ;;  %v11_v1 = vld [vmem:[%s3115_s0 + $0x10] sm:$0xff]  ;;  %v14_v6 = vld [vmem:[%s3115_s0 + $0x28] sm:$0xff] }
   0x2   :  { %v9_v2 = vld [vmem:[%s3115_s0] sm:$0xff]  ;;  %v86_v3 = vsel %vm73_vm0, %v13_v0, 0.0  ;;  %v80_v4 = vsel %vm73_vm0, %v11_v1, 0.0  ;;  %v12_v7 = vld [vmem:[%s3115_s0 + $0x18] sm:$0xff]  ;;  %v10_v8 = vld [vmem:[%s3115_s0 + $0x8] sm:$0xff] }
   0x3   :  { %v74_v5 = vsel %vm73_vm0, %v9_v2, 0.0  ;;  %87 = vadd.xlane.f32.xlu2 %v86_v3  ;;  %81 = vadd.xlane.f32.xlu1 %v80_v4 }
   0x4   :  { %75 = vadd.xlane.f32.xlu0 %v74_v5 }
   0x5   :  { %6 = vsyncpa [#allocation3], 0  ;;  %v89_v9 = vsel %vm73_vm0, %v14_v6, 0.0  ;;  %v83_v10 = vsel %vm73_vm0, %v12_v7, 0.0  ;;  %v77_v11 = vsel %vm73_vm0, %v10_v8, 0.0  ;;  %v17_v12 = vld [vmem:[%s3115_s0 + $0x40] sm:$0xff] }
   0x6   :  { %v16_v13 = vld [vmem:[%s3115_s0 + $0x38] sm:$0xff]  ;;  %v15_v14 = vld [vmem:[%s3115_s0 + $0x30] sm:$0xff]  ;;  %v98_v15 = vsel %vm73_vm0, %v17_v12, 0.0  ;;  %v18_v20 = vld [vmem:[%s3115_s0 + $0x48] sm:$0xff]  ;;  %v2162_v8 = vmov 64.0   ;;  %vm1949_vm2 = vcmask 130112  }
   0x7   :  { %v95_v16 = vsel %vm73_vm0, %v16_v13, 0.0  ;;  %v92_v17 = vsel %vm73_vm0, %v15_v14, 0.0  ;;  %v20_v18 = vld [vmem:[%s3115_s0 + $0x58] sm:$0xff]  ;;  %v19_v19 = vld [vmem:[%s3115_s0 + $0x50] sm:$0xff]  ;;  %v101_v23 = vsel %vm73_vm0, %v18_v20, 0.0  ;;  %v22_v25 = vld [vmem:[%s3115_s0 + $0x68] sm:$0xff]  ;;  %2134 = vrcp.f32 %v2162_v8 }
   0x8   :  { %v107_v21 = vsel %vm73_vm0, %v20_v18, 0.0  ;;  %v104_v22 = vsel %vm73_vm0, %v19_v19, 0.0  ;;  %v23_v24 = vld [vmem:[%s3115_s0 + $0x70] sm:$0xff]  ;;  %v21_v26 = vld [vmem:[%s3115_s0 + $0x60] sm:$0xff]  ;;  %v113_v28 = vsel %vm73_vm0, %v22_v25, 0.0  ;;  %v26_v30 = vld [vmem:[%s3115_s0 + $0x88] sm:$0xff] }
   0x9   :  { %v116_v27 = vsel %vm73_vm0, %v23_v24, 0.0  ;;  %v110_v29 = vsel %vm73_vm0, %v21_v26, 0.0  ;;  %v25_v31 = vld [vmem:[%s3115_s0 + $0x80] sm:$0xff]  ;;  %v24_v32 = vld [vmem:[%s3115_s0 + $0x78] sm:$0xff]  ;;  %v125_v33 = vsel %vm73_vm0, %v26_v30, 0.0  ;;  %v27_v38 = vld [vmem:[%s3115_s0 + $0x90] sm:$0xff] }
   0xa   :  { %v122_v34 = vsel %vm73_vm0, %v25_v31, 0.0  ;;  %v119_v35 = vsel %vm73_vm0, %v24_v32, 0.0  ;;  %v29_v36 = vld [vmem:[%s3115_s0 + $0xa0] sm:$0xff]  ;;  %v28_v37 = vld [vmem:[%s3115_s0 + $0x98] sm:$0xff]  ;;  %v128_v41 = vsel %vm73_vm0, %v27_v38, 0.0  ;;  %v31_v43 = vld [vmem:[%s3115_s0 + $0xb0] sm:$0xff] }
   0xb   :  { %90 = vadd.xlane.f32.xlu2 %v89_v9  ;;  %84 = vadd.xlane.f32.xlu1 %v83_v10  ;;  %v134_v39 = vsel %vm73_vm0, %v29_v36, 0.0  ;;  %v131_v40 = vsel %vm73_vm0, %v28_v37, 0.0  ;;  %v32_v42 = vld [vmem:[%s3115_s0 + $0xb8] sm:$0xff]  ;;  %v30_v44 = vld [vmem:[%s3115_s0 + $0xa8] sm:$0xff]  ;;  %v140_v46 = vsel %vm73_vm0, %v31_v43, 0.0  ;;  %v35_v48 = vld [vmem:[%s3115_s0 + $0xd0] sm:$0xff] }
   0xc   :  { %78 = vadd.xlane.f32.xlu0 %v77_v11  ;;  %v143_v45 = vsel %vm73_vm0, %v32_v42, 0.0  ;;  %v137_v47 = vsel %vm73_vm0, %v30_v44, 0.0  ;;  %v34_v49 = vld [vmem:[%s3115_s0 + $0xc8] sm:$0xff]  ;;  %v33_v50 = vld [vmem:[%s3115_s0 + $0xc0] sm:$0xff]  ;;  %v152_v51 = vsel %vm73_vm0, %v35_v48, 0.0  ;;  %v36_v56 = vld [vmem:[%s3115_s0 + $0xd8] sm:$0xff] }
   0xd   :  { %v149_v52 = vsel %vm73_vm0, %v34_v49, 0.0  ;;  %v146_v53 = vsel %vm73_vm0, %v33_v50, 0.0  ;;  %v38_v54 = vld [vmem:[%s3115_s0 + $0xe8] sm:$0xff]  ;;  %v37_v55 = vld [vmem:[%s3115_s0 + $0xe0] sm:$0xff]  ;;  %v155_v59 = vsel %vm73_vm0, %v36_v56, 0.0  ;;  %v40_v61 = vld [vmem:[%s3115_s0 + $0xf8] sm:$0xff] }
   0xe   :  { %v161_v57 = vsel %vm73_vm0, %v38_v54, 0.0  ;;  %v158_v58 = vsel %vm73_vm0, %v37_v55, 0.0  ;;  %v41_v60 = vld [vmem:[%s3115_s0 + $0x100] sm:$0xff]  ;;  %v39_v62 = vld [vmem:[%s3115_s0 + $0xf0] sm:$0xff]  ;;  %v167_v0 = vsel %vm73_vm0, %v40_v61, 0.0  ;;  %v44_v2 = vld [vmem:[%s3115_s0 + $0x118] sm:$0xff] }
   0xf   :  { %v170_v63 = vsel %vm73_vm0, %v41_v60, 0.0  ;;  %v164_v1 = vsel %vm73_vm0, %v39_v62, 0.0  ;;  %v43_v3 = vld [vmem:[%s3115_s0 + $0x110] sm:$0xff]  ;;  %v42_v4 = vld [vmem:[%s3115_s0 + $0x108] sm:$0xff]  ;;  %v179_v5 = vsel %vm73_vm0, %v44_v2, 0.0  ;;  %v45_v11 = vld [vmem:[%s3115_s0 + $0x120] sm:$0xff] }
  0x10   :  { %v176_v6 = vsel %vm73_vm0, %v43_v3, 0.0  ;;  %v173_v7 = vsel %vm73_vm0, %v42_v4, 0.0  ;;  %v47_v9 = vld [vmem:[%s3115_s0 + $0x130] sm:$0xff]  ;;  %v46_v10 = vld [vmem:[%s3115_s0 + $0x128] sm:$0xff]  ;;  %v182_v14 = vsel %vm73_vm0, %v45_v11, 0.0  ;;  %v48_v19 = vld [vmem:[%s3115_s0 + $0x138] sm:$0xff] }
  0x11   :  { %v188_v12 = vsel %vm73_vm0, %v47_v9, 0.0  ;;  %v185_v13 = vsel %vm73_vm0, %v46_v10, 0.0  ;;  %v53_v24 = vld [vmem:[%s3115_s0 + $0x160] sm:$0xff]  ;;  %v52_v25 = vld [vmem:[%s3115_s0 + $0x158] sm:$0xff]  ;;  %v2163_v32 = vmov 269488144  }
  0x12   :  { %v2165_v36 = vmov 1414812756   ;;  %v2166_v38 = vmov 1987475062   ;;  %v55_v42 = vld [vmem:[%s3115_s0 + $0x170] sm:$0xff]  ;;  %v57_v60 = vld [vmem:[%s3115_s0 + $0x180] sm:$0xff] }
  0x13   :  { %99 = vadd.xlane.f32.xlu2 %v98_v15  ;;  %96 = vadd.xlane.f32.xlu1 %v95_v16  ;;  %v2135_v15 = vpop.eup %2134  ;;  %v50_v16 = vld [vmem:[%s3115_s0 + $0x148] sm:$0xff]  ;;  %v410_v37 = vunpack.c.l.s4 %v2165_v36  ;;  %v218_v2 = vsel %vm73_vm0, %v57_v60, 0.0  ;;  %v61_v11 = vld [vmem:[%s3115_s0 + $0x1a0] sm:$0xff]  ;;  %vm1953_vm3 = vcmask 195712   ;;  %vm1957_vm4 = vcmask 261312   ;;  %s2115_s21 = sshll.u32 %s3116_s1, 4  ;;  %s2116_s21 = int_to_ptr.hbm [resolvable:$true] %s2115_s21 }
  0x14   :  { %93 = vadd.xlane.f32.xlu0 %v92_v17  ;;  %v49_v17 = vld [vmem:[%s3115_s0 + $0x140] sm:$0xff]  ;;  %v267_v18 = vmul.f32 64.0, %v2135_v15  ;;  %v197_v20 = vsel %vm73_vm0, %v50_v16, 0.0  ;;  %vm271_vm1 = vweird.f32 %v2135_v15  ;;  %v62_v10 = vld [vmem:[%s3115_s0 + $0x1a8] sm:$0xff]  ;;  %vm1961_vm5 = vcmask 326912  }
  0x15   :  { %v233_v16 = vsel %vm73_vm0, %v62_v10, 0.0  ;;  %vm1965_vm6 = vcmask 392512   ;;  %vm1969_vm7 = vcmask 458112   ;;  %vm1973_vm8 = vcmask 523712  }
  0x16   :  { %vm1977_vm9 = vcmask 589312   ;;  %vm1981_vm10 = vcmask 654912   ;;  %vm1985_vm11 = vcmask 720512   ;;  %vm1989_vm12 = vcmask 786112  }
  0x17   :  { %vm1993_vm13 = vcmask 851712   ;;  %vm1997_vm14 = vcmask 917312   ;;  %vm2001_vm15 = vcmask 982912  }
  0x1b   :  { %108 = vadd.xlane.f32.xlu2 %v107_v21  ;;  %105 = vadd.xlane.f32.xlu1 %v104_v22  ;;  %v194_v21 = vsel %vm73_vm0, %v49_v17, 0.0  ;;  %v191_v22 = vsel %vm73_vm0, %v48_v19, 0.0  ;;  %v230_v17 = vsel %vm73_vm0, %v61_v11, 0.0 }
  0x1c   :  { %102 = vadd.xlane.f32.xlu0 %v101_v23  ;;  %v268_v23 = vsub.f32 1.0, %v267_v18 }
  0x1e   :  { %v269_v26 = vmul.f32 %v2135_v15, %v268_v23 }
  0x20   :  { %v270_v31 = vadd.f32 %v2135_v15, %v269_v26  ;;  %v63_v26 = vld [vmem:[%s3115_s0 + $0x1b0] sm:$0xff] }
  0x23   :  { %117 = vadd.xlane.f32.xlu2 %v116_v27  ;;  %114 = vadd.xlane.f32.xlu1 %v113_v28  ;;  %v51_v27 = vld [vmem:[%s3115_s0 + $0x150] sm:$0xff]  ;;  %v206_v28 = vsel %vm73_vm0, %v53_v24, 0.0 }
  0x24   :  { %111 = vadd.xlane.f32.xlu0 %v110_v29  ;;  %v203_v29 = vsel %vm73_vm0, %v52_v25, 0.0  ;;  %v200_v30 = vsel %vm73_vm0, %v51_v27, 0.0 }
  0x2b   :  { %126 = vadd.xlane.f32.xlu2 %v125_v33  ;;  %123 = vadd.xlane.f32.xlu1 %v122_v34  ;;  %v402_v33 = vunpack.c.l.s4 %v2163_v32  ;;  %v2164_v34 = vmov 842150450  }
  0x2c   :  { %120 = vadd.xlane.f32.xlu0 %v119_v35  ;;  %v406_v35 = vunpack.c.l.s4 %v2164_v34 }
  0x2d   :  { %v2367_v43 = vunpack.c.0.s8 %v402_v33  ;;  %v236_v33 = vsel %vm73_vm0, %v63_v26, 0.0 }
  0x2e   :  { %v2369_v44 = vunpack.c.0.s8 %v406_v35 }
  0x33   :  { %135 = vadd.xlane.f32.xlu2 %v134_v39  ;;  %132 = vadd.xlane.f32.xlu1 %v131_v40  ;;  %v414_v39 = vunpack.c.l.s4 %v2166_v38  ;;  %v2359_v40 = vsel %vm271_vm1, %v2135_v15, %v270_v31  ;;  %vm2100_vm1 = vcmask 1041409  }
  0x34   :  { %129 = vadd.xlane.f32.xlu0 %v128_v41  ;;  %v56_v41 = vld [vmem:[%s3115_s0 + $0x178] sm:$0xff] }
  0x35   :  { %v215_v50 = vsel %vm73_vm0, %v56_v41, 0.0 }
  0x3b   :  { %144 = vadd.xlane.f32.xlu2 %v143_v45  ;;  %141 = vadd.xlane.f32.xlu1 %v140_v46  ;;  %v2371_v45 = vunpack.c.0.s8 %v410_v37  ;;  %v54_v46 = vld [vmem:[%s3115_s0 + $0x168] sm:$0xff] }
  0x3c   :  { %138 = vadd.xlane.f32.xlu0 %v137_v47  ;;  %v2376_v47 = vunpack.c.0.s8 %v414_v39 }
  0x43   :  { %153 = vadd.xlane.f32.xlu2 %v152_v51  ;;  %150 = vadd.xlane.f32.xlu1 %v149_v52  ;;  %v212_v51 = vsel %vm73_vm0, %v55_v42, 0.0  ;;  %v209_v52 = vsel %vm73_vm0, %v54_v46, 0.0  ;;  %v68_v42 = vld [vmem:[%s3115_s0 + $0x1d8] sm:$0xff]  ;;  %v67_v46 = vld [vmem:[%s3115_s0 + $0x1d0] sm:$0xff] }
  0x44   :  { %147 = vadd.xlane.f32.xlu0 %v146_v53 }
  0x4b   :  { %162 = vadd.xlane.f32.xlu2 %v161_v57  ;;  %159 = vadd.xlane.f32.xlu1 %v158_v58  ;;  %v59_v58 = vld [vmem:[%s3115_s0 + $0x190] sm:$0xff] }
  0x4c   :  { %156 = vadd.xlane.f32.xlu0 %v155_v59  ;;  %v58_v59 = vld [vmem:[%s3115_s0 + $0x188] sm:$0xff] }
  0x53   :  { %171 = vadd.xlane.f32.xlu2 %v170_v63  ;;  %168 = vadd.xlane.f32.xlu1 %v167_v0  ;;  %v224_v0 = vsel %vm73_vm0, %v59_v58, 0.0 }
  0x54   :  { %165 = vadd.xlane.f32.xlu0 %v164_v1  ;;  %v221_v1 = vsel %vm73_vm0, %v58_v59, 0.0 }
  0x5b   :  { %180 = vadd.xlane.f32.xlu2 %v179_v5  ;;  %177 = vadd.xlane.f32.xlu1 %v176_v6 }
  0x5c   :  { %174 = vadd.xlane.f32.xlu0 %v173_v7 }
  0x63   :  { %189 = vadd.xlane.f32.xlu2 %v188_v12  ;;  %186 = vadd.xlane.f32.xlu1 %v185_v13 }
  0x64   :  { %183 = vadd.xlane.f32.xlu0 %v182_v14  ;;  %v60_v14 = vld [vmem:[%s3115_s0 + $0x198] sm:$0xff] }
  0x65   :  { %v227_v18 = vsel %vm73_vm0, %v60_v14, 0.0 }
  0x6b   :  { %198 = vadd.xlane.f32.xlu2 %v197_v20  ;;  %195 = vadd.xlane.f32.xlu1 %v194_v21  ;;  %v65_v21 = vld [vmem:[%s3115_s0 + $0x1c0] sm:$0xff] }
  0x6c   :  { %192 = vadd.xlane.f32.xlu0 %v191_v22  ;;  %v64_v22 = vld [vmem:[%s3115_s0 + $0x1b8] sm:$0xff] }
  0x73   :  { %207 = vadd.xlane.f32.xlu2 %v206_v28  ;;  %204 = vadd.xlane.f32.xlu1 %v203_v29  ;;  %v242_v29 = vsel %vm73_vm0, %v65_v21, 0.0 }
  0x74   :  { %201 = vadd.xlane.f32.xlu0 %v200_v30  ;;  %v239_v30 = vsel %vm73_vm0, %v64_v22, 0.0 }
  0x76   :  { %v82_v57 = vpop.xlane.xlu1 %81  ;;  %v88_v7 = vpop.xlane.xlu2 %87 }
  0x77   :  { %v76_v48 = vpop.xlane.xlu0 %75  ;;  %v275_v61 = vmul.f32 %v2359_v40, %v82_v57  ;;  %v277_v19 = vmul.f32 %v2359_v40, %v88_v7 }
  0x78   :  { %v273_v49 = vmul.f32 %v2359_v40, %v76_v48  ;;  %v66_v48 = vld [vmem:[%s3115_s0 + $0x1c8] sm:$0xff] }
  0x79   :  { %v436_v6 = vperm.slane %v275_v61, %v2367_v43  ;;  %v440_v8 = vperm.slane %v275_v61, %v2369_v44  ;;  %v444_v9 = vperm.slane %v275_v61, %v2371_v45  ;;  %v448_v13 = vperm.slane %v275_v61, %v2376_v47 }
  0x7a   :  { %v404_v53 = vperm.slane %v273_v49, %v2367_v43  ;;  %v408_v54 = vperm.slane %v273_v49, %v2369_v44  ;;  %v412_v55 = vperm.slane %v273_v49, %v2371_v45  ;;  %v416_v56 = vperm.slane %v273_v49, %v2376_v47 }
  0x7b   :  { %216 = vadd.xlane.f32.xlu2 %v215_v50  ;;  %213 = vadd.xlane.f32.xlu1 %v212_v51  ;;  %v468_v23 = vperm.slane %v277_v19, %v2367_v43  ;;  %v472_v27 = vperm.slane %v277_v19, %v2369_v44  ;;  %v476_v28 = vperm.slane %v277_v19, %v2371_v45  ;;  %v251_v50 = vsel %vm73_vm0, %v68_v42, 0.0 }
  0x7c   :  { %1425 = vst [vmem:[#allocation1] ss:$4 sm:$0xff] %v404_v53  ;;  %210 = vadd.xlane.f32.xlu0 %v209_v52  ;;  %v480_v31 = vperm.slane %v277_v19, %v2376_v47  ;;  %v248_v51 = vsel %vm73_vm0, %v67_v46, 0.0 }
  0x7d   :  { %1427 = vst [vmem:[#allocation1 + $0x1] ss:$4 sm:$0xff] %v408_v54  ;;  %v245_v54 = vsel %vm73_vm0, %v66_v48, 0.0 }
  0x7e   :  { %1429 = vst [vmem:[#allocation1 + $0x2] ss:$4 sm:$0xff] %v412_v55  ;;  %v85_v20 = vpop.xlane.xlu1 %84  ;;  %v91_v24 = vpop.xlane.xlu2 %90 }
  0x7f   :  { %1431 = vst [vmem:[#allocation1 + $0x3] ss:$4 sm:$0xff] %v416_v56  ;;  %v79_v62 = vpop.xlane.xlu0 %78  ;;  %v276_v25 = vmul.f32 %v2359_v40, %v85_v20  ;;  %v278_v52 = vmul.f32 %v2359_v40, %v91_v24 }
  0x80   :  { %v274_v63 = vmul.f32 %v2359_v40, %v79_v62  ;;  %v71_v62 = vld [vmem:[%s3115_s0 + $0x1f0] sm:$0xff] }
  0x81   :  { %v452_v34 = vperm.slane %v276_v25, %v2367_v43  ;;  %v456_v37 = vperm.slane %v276_v25, %v2369_v44  ;;  %v460_v38 = vperm.slane %v276_v25, %v2371_v45  ;;  %v464_v39 = vperm.slane %v276_v25, %v2376_v47  ;;  %v72_v25 = vld [vmem:[%s3115_s0 + $0x1f8] sm:$0xff] }
  0x82   :  { %v420_v3 = vperm.slane %v274_v63, %v2367_v43  ;;  %v424_v4 = vperm.slane %v274_v63, %v2369_v44  ;;  %v428_v5 = vperm.slane %v274_v63, %v2371_v45  ;;  %v432_v15 = vperm.slane %v274_v63, %v2376_v47  ;;  %v70_v63 = vld [vmem:[%s3115_s0 + $0x1e8] sm:$0xff] }
  0x83   :  { %225 = vadd.xlane.f32.xlu2 %v224_v0  ;;  %222 = vadd.xlane.f32.xlu1 %v221_v1  ;;  %v484_v59 = vperm.slane %v278_v52, %v2367_v43  ;;  %v488_v60 = vperm.slane %v278_v52, %v2369_v44  ;;  %v492_v0 = vperm.slane %v278_v52, %v2371_v45  ;;  %v69_v1 = vld [vmem:[%s3115_s0 + $0x1e0] sm:$0xff]  ;;  %v263_v26 = vsel %vm73_vm0, %v72_v25, 0.0  ;;  %s2168_s0 = smov [#allocation2]  }
  0x84   :  { %1433 = vst [vmem:[#allocation1 + $0x20] ss:$4 sm:$0xff] %v420_v3  ;;  %219 = vadd.xlane.f32.xlu0 %v218_v2  ;;  %v496_v2 = vperm.slane %v278_v52, %v2376_v47  ;;  %s2113_s18 = sshll.u32 %s2168_s0, 4  ;;  %s2114_s18 = int_to_ptr.vmem [resolvable:$true] %s2113_s18 }
  0x85   :  { %1435 = vst [vmem:[#allocation1 + $0x21] ss:$4 sm:$0xff] %v424_v4 }
  0x86   :  { %v2412_v12 = vld.sshfl [vmem:[#allocation1] sm:$0xff pattern:$0x73625140]  ;;  %1437 = vst [vmem:[#allocation1 + $0x22] ss:$4 sm:$0xff] %v428_v5  ;;  %v100_v49 = vpop.xlane.xlu2 %99  ;;  %v97_v61 = vpop.xlane.xlu1 %96  ;;  %v260_v5 = vsel %vm73_vm0, %v71_v62, 0.0 }
  0x87   :  { %1442 = vst [vmem:[#allocation1] ss:$4 sm:$0xff] %v436_v6  ;;  %v94_v35 = vpop.xlane.xlu0 %93  ;;  %v281_v3 = vmul.f32 %v2359_v40, %v100_v49  ;;  %v257_v6 = vsel %vm73_vm0, %v70_v63, 0.0  ;;  %v280_v10 = vmul.f32 %v2359_v40, %v97_v61 }
  0x88   :  { %1443 = vst [vmem:[#allocation1 + $0x1] ss:$4 sm:$0xff] %v440_v8  ;;  %v279_v41 = vmul.f32 %v2359_v40, %v94_v35  ;;  %v254_v8 = vsel %vm73_vm0, %v69_v1, 0.0  ;;  %vm2005_vm0 = vcmask 1048512  }
  0x89   :  { %1444 = vst [vmem:[#allocation1 + $0x2] ss:$4 sm:$0xff] %v444_v9  ;;  %v532_v9 = vperm.slane %v281_v3, %v2367_v43  ;;  %v536_v11 = vperm.slane %v281_v3, %v2369_v44  ;;  %v544_v14 = vperm.slane %v281_v3, %v2376_v47  ;;  %v524_v19 = vperm.slane %v280_v10, %v2371_v45 }
  0x8a   :  { %1445 = vst [vmem:[#allocation1 + $0x3] ss:$4 sm:$0xff] %v448_v13  ;;  %v500_v53 = vperm.slane %v279_v41, %v2367_v43  ;;  %v504_v55 = vperm.slane %v279_v41, %v2369_v44  ;;  %v508_v56 = vperm.slane %v279_v41, %v2371_v45  ;;  %v512_v58 = vperm.slane %v279_v41, %v2376_v47 }
  0x8b   :  { %1439 = vst [vmem:[#allocation1 + $0x23] ss:$4 sm:$0xff] %v432_v15  ;;  %234 = vadd.xlane.f32.xlu2 %v233_v16  ;;  %231 = vadd.xlane.f32.xlu1 %v230_v17  ;;  %v540_v13 = vperm.slane %v281_v3, %v2371_v45  ;;  %v516_v16 = vperm.slane %v280_v10, %v2367_v43  ;;  %v2167_v3 = vmov 0  }
  0x8c   :  { %228 = vadd.xlane.f32.xlu0 %v227_v18  ;;  %v520_v18 = vperm.slane %v280_v10, %v2369_v44  ;;  %v528_v21 = vperm.slane %v280_v10, %v2376_v47  ;;  %2132 = vset.pattern.permute.xlu2 %v2167_v3 }
  0x8d   :  { %2131 = vset.pattern.permute.xlu1 %v2167_v3  ;;  %2133 = vset.pattern.permute.xlu0 %v2167_v3 }
  0x8e   :  { %v109_v7 = vpop.xlane.xlu2 %108  ;;  %v106_v17 = vpop.xlane.xlu1 %105 }
  0x8f   :  { %v103_v22 = vpop.xlane.xlu0 %102  ;;  %v284_v48 = vmul.f32 %v2359_v40, %v109_v7 }
  0x91   :  { %v2439_v32 = vld.sshfl [vmem:[#allocation1] sm:$0xff pattern:$0x73625140] }
  0x92   :  { %1452 = vst [vmem:[#allocation1] ss:$4 sm:$0xff] %v468_v23  ;;  %v2443_v36 = vld.sshfl [vmem:[#allocation1 + $0x20] sm:$0xff pattern:$0x73625140]  ;;  %v283_v23 = vmul.f32 %v2359_v40, %v106_v17 }
  0x93   :  { %1453 = vst [vmem:[#allocation1 + $0x1] ss:$4 sm:$0xff] %v472_v27  ;;  %243 = vadd.xlane.f32.xlu2 %v242_v29  ;;  %240 = vadd.xlane.f32.xlu1 %v239_v30  ;;  %v282_v27 = vmul.f32 %v2359_v40, %v103_v22 }
  0x94   :  { %1454 = vst [vmem:[#allocation1 + $0x2] ss:$4 sm:$0xff] %v476_v28  ;;  %237 = vadd.xlane.f32.xlu0 %v236_v33  ;;  %v564_v28 = vperm.slane %v283_v23, %v2367_v43  ;;  %v568_v29 = vperm.slane %v283_v23, %v2369_v44  ;;  %v572_v30 = vperm.slane %v283_v23, %v2371_v45 }
  0x95   :  { %1455 = vst [vmem:[#allocation1 + $0x3] ss:$4 sm:$0xff] %v480_v31  ;;  %v576_v33 = vperm.slane %v283_v23, %v2376_v47  ;;  %v552_v35 = vperm.slane %v282_v27, %v2369_v44  ;;  %v560_v41 = vperm.slane %v282_v27, %v2376_v47 }
  0x96   :  { %1446 = vst [vmem:[#allocation1 + $0x20] ss:$4 sm:$0xff] %v452_v34  ;;  %v118_v24 = vpop.xlane.xlu2 %117  ;;  %v548_v34 = vperm.slane %v282_v27, %v2367_v43 }
  0x97   :  { %1447 = vst [vmem:[#allocation1 + $0x21] ss:$4 sm:$0xff] %v456_v37  ;;  %v556_v37 = vperm.slane %v282_v27, %v2371_v45  ;;  %v287_v61 = vmul.f32 %v2359_v40, %v118_v24 }
  0x98   :  { %1448 = vst [vmem:[#allocation1 + $0x22] ss:$4 sm:$0xff] %v460_v38  ;;  %v112_v38 = vpop.xlane.xlu0 %111 }
  0x99   :  { %1449 = vst [vmem:[#allocation1 + $0x23] ss:$4 sm:$0xff] %v464_v39  ;;  %v285_v46 = vmul.f32 %v2359_v40, %v112_v38 }
  0x9b   :  { %252 = vadd.xlane.f32.xlu2 %v251_v50  ;;  %249 = vadd.xlane.f32.xlu1 %v248_v51  ;;  %v596_v49 = vperm.slane %v285_v46, %v2367_v43  ;;  %v600_v50 = vperm.slane %v285_v46, %v2369_v44  ;;  %v604_v51 = vperm.slane %v285_v46, %v2371_v45 }
  0x9c   :  { %v2465_v57 = vld.sshfl [vmem:[#allocation1] sm:$0xff pattern:$0x73625140]  ;;  %246 = vadd.xlane.f32.xlu0 %v245_v54  ;;  %v580_v54 = vperm.slane %v284_v48, %v2367_v43 }
  0x9d   :  { %1462 = vst [vmem:[#allocation1] ss:$4 sm:$0xff] %v500_v53  ;;  %v608_v53 = vperm.slane %v285_v46, %v2376_v47 }
  0x9e   :  { %1463 = vst [vmem:[#allocation1 + $0x1] ss:$4 sm:$0xff] %v504_v55  ;;  %v2518_v42 = vpop.xlane.xlu2 %126  ;;  %v584_v55 = vperm.slane %v284_v48, %v2369_v44 }
  0x9f   :  { %1464 = vst [vmem:[#allocation1 + $0x2] ss:$4 sm:$0xff] %v508_v56  ;;  %v588_v56 = vperm.slane %v284_v48, %v2371_v45 }
  0xa0   :  { %v2482_v4 = vld.sshfl [vmem:[#allocation1 + $0x20] sm:$0xff pattern:$0x73625140]  ;;  %1465 = vst [vmem:[#allocation1 + $0x3] ss:$4 sm:$0xff] %v512_v58  ;;  %v121_v63 = vpop.xlane.xlu0 %120 }
  0xa1   :  { %1456 = vst [vmem:[#allocation1 + $0x20] ss:$4 sm:$0xff] %v484_v59  ;;  %v115_v59 = vpop.xlane.xlu1 %114 }
  0xa2   :  { %1457 = vst [vmem:[#allocation1 + $0x21] ss:$4 sm:$0xff] %v488_v60  ;;  %v592_v60 = vperm.slane %v284_v48, %v2376_v47  ;;  %v286_v1 = vmul.f32 %v2359_v40, %v115_v59 }
  0xa3   :  { %1458 = vst [vmem:[#allocation1 + $0x22] ss:$4 sm:$0xff] %v492_v0  ;;  %261 = vadd.xlane.f32.xlu2 %v260_v5  ;;  %258 = vadd.xlane.f32.xlu1 %v257_v6  ;;  %v628_v0 = vperm.slane %v287_v61, %v2367_v43  ;;  %v636_v5 = vperm.slane %v287_v61, %v2371_v45 }
  0xa4   :  { %1459 = vst [vmem:[#allocation1 + $0x23] ss:$4 sm:$0xff] %v496_v2  ;;  %255 = vadd.xlane.f32.xlu0 %v254_v8  ;;  %v632_v2 = vperm.slane %v287_v61, %v2369_v44  ;;  %v640_v6 = vperm.slane %v287_v61, %v2376_v47  ;;  %v612_v8 = vperm.slane %v286_v1, %v2367_v43 }
  0xa6   :  { %v2531_v58 = vpop.xlane.xlu2 %135 }
  0xa7   :  { %v2492_v15 = vld.sshfl [vmem:[#allocation1] sm:$0xff pattern:$0x73625140] }
  0xa8   :  { %1472 = vst [vmem:[#allocation1] ss:$4 sm:$0xff] %v532_v9  ;;  %v616_v9 = vperm.slane %v286_v1, %v2369_v44 }
  0xa9   :  { %1473 = vst [vmem:[#allocation1 + $0x1] ss:$4 sm:$0xff] %v536_v11  ;;  %v124_v11 = vpop.xlane.xlu1 %123 }
  0xaa   :  { %1474 = vst [vmem:[#allocation1 + $0x2] ss:$4 sm:$0xff] %v540_v13 }
  0xab   :  { %v2497_v20 = vld.sshfl [vmem:[#allocation1 + $0x20] sm:$0xff pattern:$0x73625140]  ;;  %1475 = vst [vmem:[#allocation1 + $0x3] ss:$4 sm:$0xff] %v544_v14  ;;  %v289_v14 = vmul.f32 %v2359_v40, %v124_v11 }
  0xac   :  { %1466 = vst [vmem:[#allocation1 + $0x20] ss:$4 sm:$0xff] %v516_v16  ;;  %264 = vadd.xlane.f32.xlu0 %v263_v26  ;;  %v130_v16 = vpop.xlane.xlu0 %129 }
  0xad   :  { %1467 = vst [vmem:[#allocation1 + $0x21] ss:$4 sm:$0xff] %v520_v18  ;;  %v660_v17 = vperm.slane %v289_v14, %v2367_v43  ;;  %v664_v18 = vperm.slane %v289_v14, %v2369_v44  ;;  %v672_v22 = vperm.slane %v289_v14, %v2376_v47 }
  0xae   :  { %1468 = vst [vmem:[#allocation1 + $0x22] ss:$4 sm:$0xff] %v524_v19  ;;  %v2545_v10 = vpop.xlane.xlu2 %144  ;;  %v668_v19 = vperm.slane %v289_v14, %v2371_v45 }
  0xaf   :  { %1469 = vst [vmem:[#allocation1 + $0x23] ss:$4 sm:$0xff] %v528_v21 }
  0xb1   :  { %v133_v25 = vpop.xlane.xlu1 %132 }
  0xb2   :  { %v2509_v31 = vld.sshfl [vmem:[#allocation1] sm:$0xff pattern:$0x73625140] }
  0xb3   :  { %1482 = vst [vmem:[#allocation1] ss:$4 sm:$0xff] %v564_v28  ;;  %v291_v28 = vmul.f32 %v2359_v40, %v130_v16 }
  0xb4   :  { %1483 = vst [vmem:[#allocation1 + $0x1] ss:$4 sm:$0xff] %v568_v29  ;;  %v139_v29 = vpop.xlane.xlu0 %138 }
  0xb5   :  { %1484 = vst [vmem:[#allocation1 + $0x2] ss:$4 sm:$0xff] %v572_v30  ;;  %v290_v30 = vmul.f32 %v2359_v40, %v2518_v42  ;;  %v704_v38 = vperm.slane %v291_v28, %v2376_v47 }
  0xb6   :  { %v2515_v39 = vld.sshfl [vmem:[#allocation1 + $0x20] sm:$0xff pattern:$0x73625140]  ;;  %1485 = vst [vmem:[#allocation1 + $0x3] ss:$4 sm:$0xff] %v576_v33  ;;  %v2562_v24 = vpop.xlane.xlu2 %153  ;;  %v692_v33 = vperm.slane %v291_v28, %v2367_v43 }
  0xb7   :  { %1476 = vst [vmem:[#allocation1 + $0x20] ss:$4 sm:$0xff] %v548_v34  ;;  %v696_v34 = vperm.slane %v291_v28, %v2369_v44  ;;  %v680_v46 = vperm.slane %v290_v30, %v2369_v44  ;;  %v684_v42 = vperm.slane %v290_v30, %v2371_v45 }
  0xb8   :  { %1477 = vst [vmem:[#allocation1 + $0x21] ss:$4 sm:$0xff] %v552_v35  ;;  %v700_v35 = vperm.slane %v291_v28, %v2371_v45 }
  0xb9   :  { %1478 = vst [vmem:[#allocation1 + $0x22] ss:$4 sm:$0xff] %v556_v37 }
  0xba   :  { %1479 = vst [vmem:[#allocation1 + $0x23] ss:$4 sm:$0xff] %v560_v41  ;;  %v676_v41 = vperm.slane %v290_v30, %v2367_v43 }
  0xbb   :  { %1756 = vperm.xlu2 %2132, %v2443_v36   ;;  %v620_v36 = vperm.slane %v286_v1, %v2371_v45 }
  0xbc   :  { %1753 = vperm.xlu1 %2131, %v2412_v12   ;;  %v624_v12 = vperm.slane %v286_v1, %v2376_v47  ;;  %v148_v48 = vpop.xlane.xlu0 %147 }
  0xbd   :  { %v2525_v52 = vld.sshfl [vmem:[#allocation1] sm:$0xff pattern:$0x73625140] }
  0xbe   :  { %1492 = vst [vmem:[#allocation1] ss:$4 sm:$0xff] %v596_v49  ;;  %v688_v49 = vperm.slane %v290_v30, %v2376_v47  ;;  %v299_v30 = vmul.f32 %v2359_v40, %v2562_v24 }
  0xbf   :  { %1493 = vst [vmem:[#allocation1 + $0x1] ss:$4 sm:$0xff] %v600_v50  ;;  %v293_v50 = vmul.f32 %v2359_v40, %v2531_v58 }
  0xc0   :  { %1494 = vst [vmem:[#allocation1 + $0x2] ss:$4 sm:$0xff] %v604_v51  ;;  %1759 = vperm.xlu0 %2133, %v2439_v32   ;;  %v288_v32 = vmul.f32 %v2359_v40, %v121_v63 }
  0xc1   :  { %v1481_v62 = vld.sshfl [vmem:[#allocation1 + $0x20] sm:$0xff pattern:$0x73625140]  ;;  %1495 = vst [vmem:[#allocation1 + $0x3] ss:$4 sm:$0xff] %v608_v53  ;;  %v724_v53 = vperm.slane %v293_v50, %v2367_v43  ;;  %v736_v58 = vperm.slane %v293_v50, %v2376_v47 }
  0xc2   :  { %1486 = vst [vmem:[#allocation1 + $0x20] ss:$4 sm:$0xff] %v580_v54  ;;  %v644_v23 = vperm.slane %v288_v32, %v2367_v43  ;;  %v648_v26 = vperm.slane %v288_v32, %v2369_v44  ;;  %v656_v27 = vperm.slane %v288_v32, %v2376_v47  ;;  %v292_v54 = vmul.f32 %v2359_v40, %v133_v25 }
  0xc3   :  { %1487 = vst [vmem:[#allocation1 + $0x21] ss:$4 sm:$0xff] %v584_v55  ;;  %1762 = vperm.xlu2 %2132, %v2482_v4  }
  0xc4   :  { %1488 = vst [vmem:[#allocation1 + $0x22] ss:$4 sm:$0xff] %v588_v56  ;;  %1765 = vperm.xlu1 %2131, %v2465_v57   ;;  %v652_v57 = vperm.slane %v288_v32, %v2371_v45  ;;  %v708_v61 = vperm.slane %v292_v54, %v2367_v43  ;;  %v712_v63 = vperm.slane %v292_v54, %v2369_v44 }
  0xc5   :  { %1489 = vst [vmem:[#allocation1 + $0x23] ss:$4 sm:$0xff] %v592_v60  ;;  %v2601_v60 = vpop.xlane.xlu0 %156 }
  0xc8   :  { %v1500_v7 = vld.sshfl [vmem:[#allocation1] sm:$0xff pattern:$0x73625140]  ;;  %1780 = vperm.xlu0 %2133, %v1481_v62  }
  0xc9   :  { %1502 = vst [vmem:[#allocation1] ss:$4 sm:$0xff] %v628_v0  ;;  %v716_v0 = vperm.slane %v292_v54, %v2371_v45 }
  0xca   :  { %1503 = vst [vmem:[#allocation1 + $0x1] ss:$4 sm:$0xff] %v632_v2  ;;  %v294_v2 = vmul.f32 %v2359_v40, %v139_v29 }
  0xcb   :  { %1504 = vst [vmem:[#allocation1 + $0x2] ss:$4 sm:$0xff] %v636_v5  ;;  %1768 = vperm.xlu2 %2132, %v2497_v20   ;;  %v2580_v20 = vpop.xlane.xlu2 %162 }
  0xcc   :  { %v2548_v13 = vld.sshfl [vmem:[#allocation1 + $0x20] sm:$0xff pattern:$0x73625140]  ;;  %1505 = vst [vmem:[#allocation1 + $0x3] ss:$4 sm:$0xff] %v640_v6  ;;  %1771 = vperm.xlu1 %2131, %v2492_v15   ;;  %v142_v15 = vpop.xlane.xlu1 %141  ;;  %v748_v14 = vperm.slane %v294_v2, %v2371_v45  ;;  %v752_v32 = vperm.slane %v294_v2, %v2376_v47 }
  0xcd   :  { %1496 = vst [vmem:[#allocation1 + $0x20] ss:$4 sm:$0xff] %v612_v8  ;;  %v295_v1 = vmul.f32 %v2359_v40, %v142_v15  ;;  %v828_v15 = vperm.slane %v299_v30, %v2371_v45 }
  0xce   :  { %1497 = vst [vmem:[#allocation1 + $0x21] ss:$4 sm:$0xff] %v616_v9  ;;  %v740_v9 = vperm.slane %v294_v2, %v2367_v43 }
  0xcf   :  { %1498 = vst [vmem:[#allocation1 + $0x22] ss:$4 sm:$0xff] %v620_v36  ;;  %v756_v6 = vperm.slane %v295_v1, %v2367_v43  ;;  %v760_v8 = vperm.slane %v295_v1, %v2369_v44  ;;  %v764_v11 = vperm.slane %v295_v1, %v2371_v45  ;;  %v2619_v36 = vpop.xlane.xlu0 %165 }
  0xd0   :  { %1499 = vst [vmem:[#allocation1 + $0x23] ss:$4 sm:$0xff] %v624_v12  ;;  %1789 = vperm.xlu0 %2133, %v1500_v7   ;;  %v768_v12 = vperm.slane %v295_v1, %v2376_v47 }
  0xd3   :  { %v2558_v21 = vld.sshfl [vmem:[#allocation1] sm:$0xff pattern:$0x73625140]  ;;  %1774 = vperm.xlu2 %2132, %v2515_v39   ;;  %v732_v39 = vperm.slane %v293_v50, %v2371_v45  ;;  %v2594_v55 = vpop.xlane.xlu2 %171 }
  0xd4   :  { %1512 = vst [vmem:[#allocation1] ss:$4 sm:$0xff] %v660_v17  ;;  %1777 = vperm.xlu1 %2131, %v2509_v31   ;;  %v728_v31 = vperm.slane %v293_v50, %v2369_v44  ;;  %v2596_v56 = vpop.xlane.xlu1 %150  ;;  %v297_v17 = vmul.f32 %v2359_v40, %v148_v48 }
  0xd5   :  { %1513 = vst [vmem:[#allocation1 + $0x1] ss:$4 sm:$0xff] %v664_v18  ;;  %v296_v18 = vmul.f32 %v2359_v40, %v2545_v10  ;;  %v298_v24 = vmul.f32 %v2359_v40, %v2596_v56  ;;  %v300_v56 = vmul.f32 %v2359_v40, %v2601_v60 }
  0xd6   :  { %1514 = vst [vmem:[#allocation1 + $0x2] ss:$4 sm:$0xff] %v668_v19  ;;  %v788_v19 = vperm.slane %v297_v17, %v2367_v43  ;;  %v796_v25 = vperm.slane %v297_v17, %v2371_v45 }
  0xd7   :  { %v2566_v4 = vld.sshfl [vmem:[#allocation1 + $0x20] sm:$0xff pattern:$0x73625140]  ;;  %1515 = vst [vmem:[#allocation1 + $0x3] ss:$4 sm:$0xff] %v672_v22  ;;  %v776_v10 = vperm.slane %v296_v18, %v2369_v44  ;;  %v780_v28 = vperm.slane %v296_v18, %v2371_v45  ;;  %v784_v29 = vperm.slane %v296_v18, %v2376_v47  ;;  %v804_v48 = vperm.slane %v298_v24, %v2367_v43 }
  0xd8   :  { %1506 = vst [vmem:[#allocation1 + $0x20] ss:$4 sm:$0xff] %v644_v23  ;;  %v792_v23 = vperm.slane %v297_v17, %v2369_v44  ;;  %v808_v50 = vperm.slane %v298_v24, %v2369_v44  ;;  %v844_v60 = vperm.slane %v300_v56, %v2371_v45 }
  0xd9   :  { %1507 = vst [vmem:[#allocation1 + $0x21] ss:$4 sm:$0xff] %v648_v26 }
  0xda   :  { %1508 = vst [vmem:[#allocation1 + $0x22] ss:$4 sm:$0xff] %v652_v57  ;;  %v800_v57 = vperm.slane %v297_v17, %v2376_v47 }
  0xdb   :  { %1509 = vst [vmem:[#allocation1 + $0x23] ss:$4 sm:$0xff] %v656_v27  ;;  %1783 = vperm.xlu2 %2132, %v2525_v52   ;;  %v720_v52 = vperm.slane %v292_v54, %v2376_v47  ;;  %v2611_v3 = vpop.xlane.xlu2 %180  ;;  %v772_v27 = vperm.slane %v296_v18, %v2367_v43 }
  0xdc   :  { %1786 = vperm.xlu1 %2131, %v2548_v13   ;;  %v2613_v5 = vpop.xlane.xlu1 %159  ;;  %v744_v13 = vperm.slane %v294_v2, %v2369_v44 }
  0xde   :  { %v2577_v37 = vld.sshfl [vmem:[#allocation1] sm:$0xff pattern:$0x73625140] }
  0xdf   :  { %1522 = vst [vmem:[#allocation1] ss:$4 sm:$0xff] %v692_v33 }
  0xe0   :  { %1523 = vst [vmem:[#allocation1 + $0x1] ss:$4 sm:$0xff] %v696_v34 }
  0xe1   :  { %1524 = vst [vmem:[#allocation1 + $0x2] ss:$4 sm:$0xff] %v700_v35 }
  0xe2   :  { %v1511_v51 = vld.sshfl [vmem:[#allocation1 + $0x20] sm:$0xff pattern:$0x73625140]  ;;  %1525 = vst [vmem:[#allocation1 + $0x3] ss:$4 sm:$0xff] %v704_v38  ;;  %v824_v38 = vperm.slane %v299_v30, %v2369_v44 }
  0xe3   :  { %1516 = vst [vmem:[#allocation1 + $0x20] ss:$4 sm:$0xff] %v676_v41  ;;  %1798 = vperm.xlu0 %2133, %v1511_v51   ;;  %1792 = vperm.xlu2 %2132, %v2566_v4   ;;  %v2637_v4 = vpop.xlane.xlu0 %174  ;;  %v812_v51 = vperm.slane %v298_v24, %v2371_v45 }
  0xe4   :  { %1517 = vst [vmem:[#allocation1 + $0x21] ss:$4 sm:$0xff] %v680_v46  ;;  %1795 = vperm.xlu1 %2131, %v2558_v21   ;;  %v2630_v21 = vpop.xlane.xlu2 %189  ;;  %v2632_v22 = vpop.xlane.xlu1 %168  ;;  %v832_v46 = vperm.slane %v299_v30, %v2376_v47 }
  0xe5   :  { %1518 = vst [vmem:[#allocation1 + $0x22] ss:$4 sm:$0xff] %v684_v42 }
  0xe6   :  { %1519 = vst [vmem:[#allocation1 + $0x23] ss:$4 sm:$0xff] %v688_v49 }
  0xe9   :  { %v1530_v59 = vld.sshfl [vmem:[#allocation1] sm:$0xff pattern:$0x73625140] }
  0xea   :  { %1532 = vst [vmem:[#allocation1] ss:$4 sm:$0xff] %v724_v53  ;;  %v816_v53 = vperm.slane %v298_v24, %v2376_v47 }
  0xeb   :  { %1533 = vst [vmem:[#allocation1 + $0x1] ss:$4 sm:$0xff] %v728_v31  ;;  %1807 = vperm.xlu0 %2133, %v1530_v59   ;;  %1801 = vperm.xlu2 %2132, %v2577_v37   ;;  %v820_v37 = vperm.slane %v299_v30, %v2367_v43  ;;  %v2654_v41 = vpop.xlane.xlu0 %183  ;;  %v301_v31 = vmul.f32 %v2359_v40, %v2613_v5 }
  0xec   :  { %1534 = vst [vmem:[#allocation1 + $0x2] ss:$4 sm:$0xff] %v732_v39  ;;  %v2645_v34 = vpop.xlane.xlu2 %198  ;;  %v2647_v35 = vpop.xlane.xlu1 %177  ;;  %v848_v5 = vperm.slane %v300_v56, %v2376_v47 }
  0xed   :  { %v1521_v62 = vld.sshfl [vmem:[#allocation1 + $0x20] sm:$0xff pattern:$0x73625140]  ;;  %1535 = vst [vmem:[#allocation1 + $0x3] ss:$4 sm:$0xff] %v736_v58  ;;  %v852_v59 = vperm.slane %v301_v31, %v2367_v43  ;;  %v864_v1 = vperm.slane %v301_v31, %v2376_v47 }
  0xee   :  { %1526 = vst [vmem:[#allocation1 + $0x20] ss:$4 sm:$0xff] %v708_v61  ;;  %1804 = vperm.xlu1 %2131, %v1521_v62   ;;  %v856_v62 = vperm.slane %v301_v31, %v2369_v44 }
  0xef   :  { %1527 = vst [vmem:[#allocation1 + $0x21] ss:$4 sm:$0xff] %v712_v63  ;;  %v836_v63 = vperm.slane %v300_v56, %v2367_v43 }
  0xf0   :  { %1528 = vst [vmem:[#allocation1 + $0x22] ss:$4 sm:$0xff] %v716_v0  ;;  %v860_v0 = vperm.slane %v301_v31, %v2371_v45 }
  0xf1   :  { %1529 = vst [vmem:[#allocation1 + $0x23] ss:$4 sm:$0xff] %v720_v52  ;;  %v840_v52 = vperm.slane %v300_v56, %v2369_v44 }
  0xf3   :  { %v2669_v58 = vpop.xlane.xlu0 %192 }
  0xf4   :  { %v1540_v7 = vld.sshfl [vmem:[#allocation1] sm:$0xff pattern:$0x73625140]  ;;  %v2663_v39 = vpop.xlane.xlu2 %207  ;;  %v2665_v54 = vpop.xlane.xlu1 %186 }
  0xf5   :  { %1542 = vst [vmem:[#allocation1] ss:$4 sm:$0xff] %v756_v6  ;;  %v303_v6 = vmul.f32 %v2359_v40, %v2619_v36 }
  0xf6   :  { %1543 = vst [vmem:[#allocation1 + $0x1] ss:$4 sm:$0xff] %v760_v8  ;;  %1813 = vperm.xlu1 %2131, %v1540_v7  }
  0xf7   :  { %1544 = vst [vmem:[#allocation1 + $0x2] ss:$4 sm:$0xff] %v764_v11  ;;  %v892_v36 = vperm.slane %v303_v6, %v2371_v45 }
  0xf8   :  { %v1531_v16 = vld.sshfl [vmem:[#allocation1 + $0x20] sm:$0xff pattern:$0x73625140]  ;;  %1545 = vst [vmem:[#allocation1 + $0x3] ss:$4 sm:$0xff] %v768_v12  ;;  %v302_v12 = vmul.f32 %v2359_v40, %v2580_v20 }
  0xf9   :  { %1536 = vst [vmem:[#allocation1 + $0x20] ss:$4 sm:$0xff] %v740_v9  ;;  %1810 = vperm.xlu2 %2132, %v1531_v16   ;;  %v884_v9 = vperm.slane %v303_v6, %v2367_v43  ;;  %v896_v16 = vperm.slane %v303_v6, %v2376_v47 }
  0xfa   :  { %1537 = vst [vmem:[#allocation1 + $0x21] ss:$4 sm:$0xff] %v744_v13  ;;  %v888_v13 = vperm.slane %v303_v6, %v2369_v44  ;;  %v872_v17 = vperm.slane %v302_v12, %v2369_v44  ;;  %v876_v20 = vperm.slane %v302_v12, %v2371_v45 }
  0xfb   :  { %1538 = vst [vmem:[#allocation1 + $0x22] ss:$4 sm:$0xff] %v748_v14  ;;  %v2686_v11 = vpop.xlane.xlu0 %201 }
  0xfc   :  { %1539 = vst [vmem:[#allocation1 + $0x23] ss:$4 sm:$0xff] %v752_v32  ;;  %v2681_v7 = vpop.xlane.xlu2 %216  ;;  %v2683_v8 = vpop.xlane.xlu1 %195  ;;  %v868_v32 = vperm.slane %v302_v12, %v2367_v43 }
  0xff   :  { %v1550_v26 = vld.sshfl [vmem:[#allocation1] sm:$0xff pattern:$0x73625140] }
 0x100   :  { %1552 = vst [vmem:[#allocation1] ss:$4 sm:$0xff] %v788_v19 }
 0x101   :  { %1553 = vst [vmem:[#allocation1 + $0x1] ss:$4 sm:$0xff] %v792_v23  ;;  %1819 = vperm.xlu2 %2132, %v1550_v26   ;;  %v305_v26 = vmul.f32 %v2359_v40, %v2594_v55 }
 0x102   :  { %1554 = vst [vmem:[#allocation1 + $0x2] ss:$4 sm:$0xff] %v796_v25  ;;  %v880_v25 = vperm.slane %v302_v12, %v2376_v47 }
 0x103   :  { %v1541_v33 = vld.sshfl [vmem:[#allocation1 + $0x20] sm:$0xff pattern:$0x73625140]  ;;  %1555 = vst [vmem:[#allocation1 + $0x3] ss:$4 sm:$0xff] %v800_v57  ;;  %v2703_v57 = vpop.xlane.xlu0 %210  ;;  %v924_v30 = vperm.slane %v305_v26, %v2371_v45 }
 0x104   :  { %1546 = vst [vmem:[#allocation1 + $0x20] ss:$4 sm:$0xff] %v772_v27  ;;  %1816 = vperm.xlu0 %2133, %v1541_v33   ;;  %v2695_v19 = vpop.xlane.xlu2 %225  ;;  %v2697_v23 = vpop.xlane.xlu1 %204  ;;  %v916_v27 = vperm.slane %v305_v26, %v2367_v43  ;;  %v928_v33 = vperm.slane %v305_v26, %v2376_v47 }
 0x105   :  { %1547 = vst [vmem:[#allocation1 + $0x21] ss:$4 sm:$0xff] %v776_v10  ;;  %v304_v10 = vmul.f32 %v2359_v40, %v2632_v22 }
 0x106   :  { %1548 = vst [vmem:[#allocation1 + $0x22] ss:$4 sm:$0xff] %v780_v28  ;;  %v920_v28 = vperm.slane %v305_v26, %v2369_v44 }
 0x107   :  { %1549 = vst [vmem:[#allocation1 + $0x23] ss:$4 sm:$0xff] %v784_v29  ;;  %v900_v55 = vperm.slane %v304_v10, %v2367_v43  ;;  %v904_v22 = vperm.slane %v304_v10, %v2369_v44  ;;  %v908_v24 = vperm.slane %v304_v10, %v2371_v45 }
 0x10a   :  { %v1560_v42 = vld.sshfl [vmem:[#allocation1] sm:$0xff pattern:$0x73625140] }
 0x10b   :  { %1562 = vst [vmem:[#allocation1] ss:$4 sm:$0xff] %v820_v37 }
 0x10c   :  { %1563 = vst [vmem:[#allocation1 + $0x1] ss:$4 sm:$0xff] %v824_v38  ;;  %1825 = vperm.xlu0 %2133, %v1560_v42   ;;  %v2712_v37 = vpop.xlane.xlu2 %234  ;;  %v2714_v38 = vpop.xlane.xlu1 %213  ;;  %v307_v42 = vmul.f32 %v2359_v40, %v2647_v35 }
 0x10d   :  { %1564 = vst [vmem:[#allocation1 + $0x2] ss:$4 sm:$0xff] %v828_v15 }
 0x10e   :  { %v1551_v49 = vld.sshfl [vmem:[#allocation1 + $0x20] sm:$0xff pattern:$0x73625140]  ;;  %1565 = vst [vmem:[#allocation1 + $0x3] ss:$4 sm:$0xff] %v832_v46  ;;  %v912_v46 = vperm.slane %v304_v10, %v2376_v47  ;;  %v960_v35 = vperm.slane %v307_v42, %v2376_v47  ;;  %v310_v10 = vmul.f32 %v2359_v40, %v2665_v54 }
 0x10f   :  { %1556 = vst [vmem:[#allocation1 + $0x20] ss:$4 sm:$0xff] %v804_v48  ;;  %1822 = vperm.xlu1 %2131, %v1551_v49   ;;  %v2721_v48 = vpop.xlane.xlu0 %219  ;;  %v306_v49 = vmul.f32 %v2359_v40, %v2637_v4 }
 0x110   :  { %1557 = vst [vmem:[#allocation1 + $0x21] ss:$4 sm:$0xff] %v808_v50  ;;  %v948_v50 = vperm.slane %v307_v42, %v2367_v43  ;;  %v1004_v54 = vperm.slane %v310_v10, %v2371_v45 }
 0x111   :  { %1558 = vst [vmem:[#allocation1 + $0x22] ss:$4 sm:$0xff] %v812_v51 }
 0x112   :  { %1559 = vst [vmem:[#allocation1 + $0x23] ss:$4 sm:$0xff] %v816_v53  ;;  %v952_v53 = vperm.slane %v307_v42, %v2369_v44 }
 0x114   :  { %v2727_v31 = vpop.xlane.xlu2 %243  ;;  %v2729_v56 = vpop.xlane.xlu1 %222 }
 0x115   :  { %v1570_v61 = vld.sshfl [vmem:[#allocation1] sm:$0xff pattern:$0x73625140] }
 0x116   :  { %1572 = vst [vmem:[#allocation1] ss:$4 sm:$0xff] %v852_v59  ;;  %v956_v59 = vperm.slane %v307_v42, %v2371_v45  ;;  %v313_v42 = vmul.f32 %v2359_v40, %v2683_v8 }
 0x117   :  { %1573 = vst [vmem:[#allocation1 + $0x1] ss:$4 sm:$0xff] %v856_v62  ;;  %1831 = vperm.xlu1 %2131, %v1570_v61   ;;  %v932_v61 = vperm.slane %v306_v49, %v2367_v43  ;;  %v2734_v62 = vpop.xlane.xlu0 %228 }
 0x118   :  { %1574 = vst [vmem:[#allocation1 + $0x2] ss:$4 sm:$0xff] %v860_v0  ;;  %v940_v0 = vperm.slane %v306_v49, %v2371_v45  ;;  %v1056_v8 = vperm.slane %v313_v42, %v2376_v47 }
 0x119   :  { %v1561_v2 = vld.sshfl [vmem:[#allocation1 + $0x20] sm:$0xff pattern:$0x73625140]  ;;  %1575 = vst [vmem:[#allocation1 + $0x3] ss:$4 sm:$0xff] %v864_v1  ;;  %v309_v1 = vmul.f32 %v2359_v40, %v2654_v41 }
 0x11a   :  { %1566 = vst [vmem:[#allocation1 + $0x20] ss:$4 sm:$0xff] %v836_v63  ;;  %1828 = vperm.xlu2 %2132, %v1561_v2   ;;  %v936_v63 = vperm.slane %v306_v49, %v2369_v44 }
 0x11b   :  { %1567 = vst [vmem:[#allocation1 + $0x21] ss:$4 sm:$0xff] %v840_v52  ;;  %v944_v52 = vperm.slane %v306_v49, %v2376_v47  ;;  %v980_v6 = vperm.slane %v309_v1, %v2367_v43  ;;  %v992_v41 = vperm.slane %v309_v1, %v2376_v47 }
 0x11c   :  { %1568 = vst [vmem:[#allocation1 + $0x22] ss:$4 sm:$0xff] %v844_v60  ;;  %v2741_v60 = vpop.xlane.xlu2 %252  ;;  %v2743_v2 = vpop.xlane.xlu1 %231 }
 0x11d   :  { %1569 = vst [vmem:[#allocation1 + $0x23] ss:$4 sm:$0xff] %v848_v5  ;;  %v308_v5 = vmul.f32 %v2359_v40, %v2611_v3 }
 0x11f   :  { %v2749_v12 = vpop.xlane.xlu0 %237 }
 0x120   :  { %v1580_v14 = vld.sshfl [vmem:[#allocation1] sm:$0xff pattern:$0x73625140] }
 0x121   :  { %1582 = vst [vmem:[#allocation1] ss:$4 sm:$0xff] %v884_v9 }
 0x122   :  { %1583 = vst [vmem:[#allocation1 + $0x1] ss:$4 sm:$0xff] %v888_v13  ;;  %1837 = vperm.xlu2 %2132, %v1580_v14   ;;  %v984_v13 = vperm.slane %v309_v1, %v2369_v44  ;;  %v964_v14 = vperm.slane %v308_v5, %v2367_v43 }
 0x123   :  { %1584 = vst [vmem:[#allocation1 + $0x2] ss:$4 sm:$0xff] %v892_v36  ;;  %v988_v36 = vperm.slane %v309_v1, %v2371_v45 }
 0x124   :  { %v1571_v18 = vld.sshfl [vmem:[#allocation1 + $0x20] sm:$0xff pattern:$0x73625140]  ;;  %1585 = vst [vmem:[#allocation1 + $0x3] ss:$4 sm:$0xff] %v896_v16  ;;  %v968_v16 = vperm.slane %v308_v5, %v2369_v44 }
 0x125   :  { %1576 = vst [vmem:[#allocation1 + $0x20] ss:$4 sm:$0xff] %v868_v32  ;;  %1834 = vperm.xlu0 %2133, %v1571_v18   ;;  %v972_v32 = vperm.slane %v308_v5, %v2371_v45  ;;  %v976_v18 = vperm.slane %v308_v5, %v2376_v47 }
 0x126   :  { %1577 = vst [vmem:[#allocation1 + $0x21] ss:$4 sm:$0xff] %v872_v17  ;;  %v2756_v17 = vpop.xlane.xlu1 %240 }
 0x127   :  { %1578 = vst [vmem:[#allocation1 + $0x22] ss:$4 sm:$0xff] %v876_v20  ;;  %v311_v20 = vmul.f32 %v2359_v40, %v2630_v21  ;;  %v2763_v26 = vpop.xlane.xlu0 %246 }
 0x128   :  { %1579 = vst [vmem:[#allocation1 + $0x23] ss:$4 sm:$0xff] %v880_v25  ;;  %v2761_v25 = vpop.xlane.xlu2 %261 }
 0x129   :  { %v1024_v21 = vperm.slane %v311_v20, %v2376_v47 }
 0x12b   :  { %v1590_v29 = vld.sshfl [vmem:[#allocation1] sm:$0xff pattern:$0x73625140] }
 0x12c   :  { %1592 = vst [vmem:[#allocation1] ss:$4 sm:$0xff] %v916_v27  ;;  %v1012_v27 = vperm.slane %v311_v20, %v2367_v43 }
 0x12d   :  { %1593 = vst [vmem:[#allocation1 + $0x1] ss:$4 sm:$0xff] %v920_v28  ;;  %1843 = vperm.xlu0 %2133, %v1590_v29   ;;  %v1016_v28 = vperm.slane %v311_v20, %v2369_v44 }
 0x12e   :  { %1594 = vst [vmem:[#allocation1 + $0x2] ss:$4 sm:$0xff] %v924_v30  ;;  %v1020_v30 = vperm.slane %v311_v20, %v2371_v45 }
 0x12f   :  { %v1581_v15 = vld.sshfl [vmem:[#allocation1 + $0x20] sm:$0xff pattern:$0x73625140]  ;;  %1595 = vst [vmem:[#allocation1 + $0x3] ss:$4 sm:$0xff] %v928_v33  ;;  %v2771_v33 = vpop.xlane.xlu1 %249 }
 0x130   :  { %1586 = vst [vmem:[#allocation1 + $0x20] ss:$4 sm:$0xff] %v900_v55  ;;  %1840 = vperm.xlu1 %2131, %v1581_v15   ;;  %v996_v55 = vperm.slane %v310_v10, %v2367_v43  ;;  %v1757_v49 = vpop.permute.xlu2 %1756 }
 0x131   :  { %1587 = vst [vmem:[#allocation1 + $0x21] ss:$4 sm:$0xff] %v904_v22  ;;  %v1000_v22 = vperm.slane %v310_v10, %v2369_v44 }
 0x132   :  { %1588 = vst [vmem:[#allocation1 + $0x22] ss:$4 sm:$0xff] %v908_v24  ;;  %v2776_v24 = vpop.xlane.xlu0 %255 }
 0x133   :  { %1589 = vst [vmem:[#allocation1 + $0x23] ss:$4 sm:$0xff] %v912_v46  ;;  %v1008_v46 = vperm.slane %v310_v10, %v2376_v47 }
 0x136   :  { %v1600_v51 = vld.sshfl [vmem:[#allocation1] sm:$0xff pattern:$0x73625140] }
 0x137   :  { %1602 = vst [vmem:[#allocation1] ss:$4 sm:$0xff] %v948_v50  ;;  %v1944_v50 = vlaneseq }
 0x138   :  { %1603 = vst [vmem:[#allocation1 + $0x1] ss:$4 sm:$0xff] %v952_v53  ;;  %1849 = vperm.xlu1 %2131, %v1600_v51   ;;  %v312_v51 = vmul.f32 %v2359_v40, %v2669_v58  ;;  %v1044_v53 = vperm.slane %v313_v42, %v2367_v43 }
 0x139   :  { %1604 = vst [vmem:[#allocation1 + $0x2] ss:$4 sm:$0xff] %v956_v59  ;;  %v2784_v59 = vpop.xlane.xlu1 %258 }
 0x13a   :  { %v1591_v4 = vld.sshfl [vmem:[#allocation1 + $0x20] sm:$0xff pattern:$0x73625140]  ;;  %1605 = vst [vmem:[#allocation1 + $0x3] ss:$4 sm:$0xff] %v960_v35  ;;  %v1028_v58 = vperm.slane %v312_v51, %v2367_v43  ;;  %v1032_v1 = vperm.slane %v312_v51, %v2369_v44  ;;  %v1036_v5 = vperm.slane %v312_v51, %v2371_v45 }
 0x13b   :  { %1596 = vst [vmem:[#allocation1 + $0x20] ss:$4 sm:$0xff] %v932_v61  ;;  %1846 = vperm.xlu2 %2132, %v1591_v4   ;;  %v1048_v61 = vperm.slane %v313_v42, %v2369_v44  ;;  %v1052_v4 = vperm.slane %v313_v42, %v2371_v45 }
 0x13c   :  { %1597 = vst [vmem:[#allocation1 + $0x21] ss:$4 sm:$0xff] %v936_v63  ;;  %v2788_v63 = vand.u32 127, %v1944_v50 }
 0x13d   :  { %1598 = vst [vmem:[#allocation1 + $0x22] ss:$4 sm:$0xff] %v940_v0  ;;  %v2791_v0 = vpop.xlane.xlu0 %264 }
 0x13e   :  { %1599 = vst [vmem:[#allocation1 + $0x23] ss:$4 sm:$0xff] %v944_v52  ;;  %v2811_v20 = vadd.s32 4294967272, %v2788_v63  ;;  %v2824_v50 = vadd.s32 4294967264, %v2788_v63 }
 0x141   :  { %v1610_v9 = vld.sshfl [vmem:[#allocation1] sm:$0xff pattern:$0x73625140] }
 0x142   :  { %1612 = vst [vmem:[#allocation1] ss:$4 sm:$0xff] %v980_v6  ;;  %v2797_v6 = vadd.s32 4294967288, %v2788_v63 }
 0x143   :  { %1613 = vst [vmem:[#allocation1 + $0x1] ss:$4 sm:$0xff] %v984_v13  ;;  %1855 = vperm.xlu2 %2132, %v1610_v9   ;;  %v1763_v9 = vpop.permute.xlu2 %1762  ;;  %v1040_v13 = vperm.slane %v312_v51, %v2376_v47 }
 0x144   :  { %1614 = vst [vmem:[#allocation1 + $0x2] ss:$4 sm:$0xff] %v988_v36  ;;  %v315_v36 = vmul.f32 %v2359_v40, %v2686_v11 }
 0x145   :  { %v1601_v3 = vld.sshfl [vmem:[#allocation1 + $0x20] sm:$0xff pattern:$0x73625140]  ;;  %1615 = vst [vmem:[#allocation1 + $0x3] ss:$4 sm:$0xff] %v992_v41  ;;  %v1754_v41 = vpop.permute.xlu1 %1753  ;;  %v1760_v11 = vpop.permute.xlu0 %1759 }
 0x146   :  { %1606 = vst [vmem:[#allocation1 + $0x20] ss:$4 sm:$0xff] %v964_v14  ;;  %1852 = vperm.xlu0 %2133, %v1601_v3   ;;  %v1946_v14 = vperm.slane %v1754_v41, %v2788_v63  ;;  %v2805_v3 = vadd.s32 4294967280, %v2788_v63  ;;  %v1080_v10 = vperm.slane %v315_v36, %v2369_v44 }
 0x147   :  { %1607 = vst [vmem:[#allocation1 + $0x21] ss:$4 sm:$0xff] %v968_v16  ;;  %v1948_v16 = vperm.slane %v1757_v49, %v2797_v6 }
 0x148   :  { %1608 = vst [vmem:[#allocation1 + $0x22] ss:$4 sm:$0xff] %v972_v32  ;;  %v314_v32 = vmul.f32 %v2359_v40, %v2645_v34 }
 0x149   :  { %1609 = vst [vmem:[#allocation1 + $0x23] ss:$4 sm:$0xff] %v976_v18  ;;  %v1076_v18 = vperm.slane %v315_v36, %v2367_v43 }
 0x14a   :  { %v1068_v49 = vperm.slane %v314_v32, %v2371_v45 }
 0x14c   :  { %v1620_v29 = vld.sshfl [vmem:[#allocation1] sm:$0xff pattern:$0x73625140] }
 0x14d   :  { %1622 = vst [vmem:[#allocation1] ss:$4 sm:$0xff] %v1012_v27  ;;  %v1766_v42 = vpop.permute.xlu1 %1765 }
 0x14e   :  { %1623 = vst [vmem:[#allocation1 + $0x1] ss:$4 sm:$0xff] %v1016_v28  ;;  %1861 = vperm.xlu0 %2133, %v1620_v29   ;;  %v1950_v28 = vsel %vm1949_vm2, %v1948_v16, %v1946_v14  ;;  %v1952_v29 = vperm.slane %v1760_v11, %v2805_v3 }
 0x14f   :  { %1624 = vst [vmem:[#allocation1 + $0x2] ss:$4 sm:$0xff] %v1020_v30  ;;  %v1084_v30 = vperm.slane %v315_v36, %v2371_v45 }
 0x150   :  { %v1611_v15 = vld.sshfl [vmem:[#allocation1 + $0x20] sm:$0xff pattern:$0x73625140]  ;;  %1625 = vst [vmem:[#allocation1 + $0x3] ss:$4 sm:$0xff] %v1024_v21  ;;  %v1088_v21 = vperm.slane %v315_v36, %v2376_v47  ;;  %v1954_v34 = vsel %vm1953_vm3, %v1952_v29, %v1950_v28  ;;  %v319_v29 = vmul.f32 %v2359_v40, %v2714_v38  ;;  %v318_v38 = vmul.f32 %v2359_v40, %v2703_v57 }
 0x151   :  { %1616 = vst [vmem:[#allocation1 + $0x20] ss:$4 sm:$0xff] %v996_v55  ;;  %1858 = vperm.xlu1 %2131, %v1611_v15   ;;  %v1060_v55 = vperm.slane %v314_v32, %v2367_v43  ;;  %v1956_v15 = vperm.slane %v1763_v9, %v2811_v20  ;;  %v2841_v9 = vadd.s32 4294967248, %v2788_v63 }
 0x152   :  { %1617 = vst [vmem:[#allocation1 + $0x21] ss:$4 sm:$0xff] %v1000_v22  ;;  %v1064_v22 = vperm.slane %v314_v32, %v2369_v44 }
 0x153   :  { %1618 = vst [vmem:[#allocation1 + $0x22] ss:$4 sm:$0xff] %v1004_v54  ;;  %v1958_v51 = vsel %vm1957_vm4, %v1956_v15, %v1954_v34  ;;  %v2859_v34 = vadd.s32 4294967224, %v2788_v63  ;;  %v1781_v15 = vpop.permute.xlu0 %1780 }
 0x154   :  { %1619 = vst [vmem:[#allocation1 + $0x23] ss:$4 sm:$0xff] %v1008_v46  ;;  %v1769_v46 = vpop.permute.xlu2 %1768 }
 0x157   :  { %v1630_v35 = vld.sshfl [vmem:[#allocation1] sm:$0xff pattern:$0x73625140] }
 0x158   :  { %1632 = vst [vmem:[#allocation1] ss:$4 sm:$0xff] %v1044_v53  ;;  %v1072_v53 = vperm.slane %v314_v32, %v2376_v47 }
 0x159   :  { %1633 = vst [vmem:[#allocation1 + $0x1] ss:$4 sm:$0xff] %v1048_v61  ;;  %1867 = vperm.xlu1 %2131, %v1630_v35   ;;  %v317_v35 = vmul.f32 %v2359_v40, %v2663_v39  ;;  %v1960_v61 = vperm.slane %v1766_v42, %v2824_v50  ;;  %v1144_v42 = vperm.slane %v319_v29, %v2369_v44 }
 0x15a   :  { %1634 = vst [vmem:[#allocation1 + $0x2] ss:$4 sm:$0xff] %v1052_v4 }
 0x15b   :  { %v1621_v52 = vld.sshfl [vmem:[#allocation1 + $0x20] sm:$0xff pattern:$0x73625140]  ;;  %1635 = vst [vmem:[#allocation1 + $0x3] ss:$4 sm:$0xff] %v1056_v8  ;;  %v1108_v4 = vperm.slane %v317_v35, %v2367_v43  ;;  %v316_v8 = vmul.f32 %v2359_v40, %v2697_v23  ;;  %v1116_v39 = vperm.slane %v317_v35, %v2371_v45  ;;  %v1120_v36 = vperm.slane %v317_v35, %v2376_v47 }
 0x15c   :  { %1626 = vst [vmem:[#allocation1 + $0x20] ss:$4 sm:$0xff] %v1028_v58  ;;  %1864 = vperm.xlu2 %2132, %v1621_v52   ;;  %v2835_v58 = vadd.s32 4294967256, %v2788_v63  ;;  %v1962_v52 = vsel %vm1961_vm5, %v1960_v61, %v1958_v51  ;;  %v2845_v23 = vadd.s32 4294967240, %v2788_v63  ;;  %v1775_v16 = vpop.permute.xlu2 %1774  ;;  %v1152_v61 = vperm.slane %v319_v29, %v2376_v47 }
 0x15d   :  { %1627 = vst [vmem:[#allocation1 + $0x21] ss:$4 sm:$0xff] %v1032_v1  ;;  %v1112_v1 = vperm.slane %v317_v35, %v2369_v44  ;;  %v1092_v41 = vperm.slane %v316_v8, %v2367_v43  ;;  %v1100_v11 = vperm.slane %v316_v8, %v2371_v45  ;;  %v1104_v28 = vperm.slane %v316_v8, %v2376_v47 }
 0x15e   :  { %1628 = vst [vmem:[#allocation1 + $0x22] ss:$4 sm:$0xff] %v1036_v5  ;;  %v1964_v14 = vperm.slane %v1769_v46, %v2835_v58  ;;  %v1140_v46 = vperm.slane %v319_v29, %v2367_v43  ;;  %v1980_v35 = vperm.slane %v1781_v15, %v2859_v34 }
 0x15f   :  { %1629 = vst [vmem:[#allocation1 + $0x23] ss:$4 sm:$0xff] %v1040_v13  ;;  %v1772_v13 = vpop.permute.xlu1 %1771 }
 0x162   :  { %v1640_v27 = vld.sshfl [vmem:[#allocation1] sm:$0xff pattern:$0x73625140] }
 0x163   :  { %1642 = vst [vmem:[#allocation1] ss:$4 sm:$0xff] %v1076_v18  ;;  %v1096_v18 = vperm.slane %v316_v8, %v2369_v44  ;;  %v2876_v8 = vadd.s32 4294967216, %v2788_v63 }
 0x164   :  { %1643 = vst [vmem:[#allocation1 + $0x1] ss:$4 sm:$0xff] %v1080_v10  ;;  %1873 = vperm.xlu2 %2132, %v1640_v27   ;;  %v1966_v27 = vsel %vm1965_vm6, %v1964_v14, %v1962_v52  ;;  %v1968_v10 = vperm.slane %v1772_v13, %v2841_v9  ;;  %v1132_v13 = vperm.slane %v318_v38, %v2371_v45 }
 0x165   :  { %1644 = vst [vmem:[#allocation1 + $0x2] ss:$4 sm:$0xff] %v1084_v30  ;;  %v1972_v30 = vperm.slane %v1775_v16, %v2845_v23  ;;  %v2886_v16 = vadd.s32 4294967200, %v2788_v63 }
 0x166   :  { %v1631_v54 = vld.sshfl [vmem:[#allocation1 + $0x20] sm:$0xff pattern:$0x73625140]  ;;  %1645 = vst [vmem:[#allocation1 + $0x3] ss:$4 sm:$0xff] %v1088_v21  ;;  %v1970_v21 = vsel %vm1969_vm7, %v1968_v10, %v1966_v27  ;;  %v320_v10 = vmul.f32 %v2359_v40, %v2681_v7 }
 0x167   :  { %1636 = vst [vmem:[#allocation1 + $0x20] ss:$4 sm:$0xff] %v1060_v55  ;;  %1870 = vperm.xlu0 %2133, %v1631_v54   ;;  %v1974_v55 = vsel %vm1973_vm8, %v1972_v30, %v1970_v21  ;;  %v1778_v54 = vpop.permute.xlu1 %1777 }
 0x168   :  { %1637 = vst [vmem:[#allocation1 + $0x21] ss:$4 sm:$0xff] %v1064_v22  ;;  %v2863_v22 = vadd.s32 4294967232, %v2788_v63 }
 0x169   :  { %1638 = vst [vmem:[#allocation1 + $0x22] ss:$4 sm:$0xff] %v1068_v49 }
 0x16a   :  { %1639 = vst [vmem:[#allocation1 + $0x23] ss:$4 sm:$0xff] %v1072_v53  ;;  %v1976_v51 = vperm.slane %v1778_v54, %v2863_v22  ;;  %v1148_v53 = vperm.slane %v319_v29, %v2371_v45  ;;  %v1156_v54 = vperm.slane %v320_v10, %v2367_v43 }
 0x16c   :  { %v1978_v57 = vsel %vm1977_vm9, %v1976_v51, %v1974_v55 }
 0x16d   :  { %v1650_v5 = vld.sshfl [vmem:[#allocation1] sm:$0xff pattern:$0x73625140]  ;;  %v1982_v52 = vsel %vm1981_vm10, %v1980_v35, %v1978_v57  ;;  %v1168_v35 = vperm.slane %v320_v10, %v2376_v47 }
 0x16e   :  { %1652 = vst [vmem:[#allocation1] ss:$4 sm:$0xff] %v1108_v4  ;;  %v1124_v4 = vperm.slane %v318_v38, %v2367_v43 }
 0x16f   :  { %1653 = vst [vmem:[#allocation1 + $0x1] ss:$4 sm:$0xff] %v1112_v1  ;;  %1879 = vperm.xlu0 %2133, %v1650_v5   ;;  %v1128_v5 = vperm.slane %v318_v38, %v2369_v44 }
 0x170   :  { %1654 = vst [vmem:[#allocation1 + $0x2] ss:$4 sm:$0xff] %v1116_v39  ;;  %v1784_v39 = vpop.permute.xlu2 %1783 }
 0x171   :  { %v1641_v32 = vld.sshfl [vmem:[#allocation1 + $0x20] sm:$0xff pattern:$0x73625140]  ;;  %1655 = vst [vmem:[#allocation1 + $0x3] ss:$4 sm:$0xff] %v1120_v36  ;;  %v1136_v36 = vperm.slane %v318_v38, %v2376_v47  ;;  %v1984_v14 = vperm.slane %v1784_v39, %v2876_v8  ;;  %v2903_v38 = vadd.s32 4294967192, %v2788_v63 }
 0x172   :  { %1646 = vst [vmem:[#allocation1 + $0x20] ss:$4 sm:$0xff] %v1092_v41  ;;  %1876 = vperm.xlu1 %2131, %v1641_v32   ;;  %v321_v41 = vmul.f32 %v2359_v40, %v2721_v48  ;;  %v1790_v32 = vpop.permute.xlu0 %1789 }
 0x173   :  { %1647 = vst [vmem:[#allocation1 + $0x21] ss:$4 sm:$0xff] %v1096_v18  ;;  %v2889_v18 = vadd.s32 4294967208, %v2788_v63  ;;  %v1986_v27 = vsel %vm1985_vm11, %v1984_v14, %v1982_v52  ;;  %v1992_v55 = vperm.slane %v1790_v32, %v2886_v16 }
 0x174   :  { %1648 = vst [vmem:[#allocation1 + $0x22] ss:$4 sm:$0xff] %v1100_v11  ;;  %v1787_v11 = vpop.permute.xlu1 %1786  ;;  %v1172_v48 = vperm.slane %v321_v41, %v2367_v43  ;;  %v1180_v21 = vperm.slane %v321_v41, %v2371_v45  ;;  %v1184_v15 = vperm.slane %v321_v41, %v2376_v47 }
 0x175   :  { %1649 = vst [vmem:[#allocation1 + $0x23] ss:$4 sm:$0xff] %v1104_v28  ;;  %v1176_v28 = vperm.slane %v321_v41, %v2369_v44  ;;  %v1988_v30 = vperm.slane %v1787_v11, %v2889_v18 }
 0x177   :  { %v1990_v7 = vsel %vm1989_vm12, %v1988_v30, %v1986_v27 }
 0x178   :  { %v1660_v49 = vld.sshfl [vmem:[#allocation1] sm:$0xff pattern:$0x73625140]  ;;  %v1793_v51 = vpop.permute.xlu2 %1792 }
 0x179   :  { %1662 = vst [vmem:[#allocation1] ss:$4 sm:$0xff] %v1140_v46  ;;  %v1994_v46 = vsel %vm1993_vm13, %v1992_v55, %v1990_v7  ;;  %v1996_v57 = vperm.slane %v1793_v51, %v2903_v38 }
 0x17a   :  { %1885 = vperm.xlu1 %2131, %v1660_v49   ;;  %1663 = vst [vmem:[#allocation1 + $0x1] ss:$4 sm:$0xff] %v1144_v42  ;;  %v1160_v42 = vperm.slane %v320_v10, %v2369_v44  ;;  %v1799_v52 = vpop.permute.xlu0 %1798 }
 0x17b   :  { %1664 = vst [vmem:[#allocation1 + $0x2] ss:$4 sm:$0xff] %v1148_v53  ;;  %v1164_v53 = vperm.slane %v320_v10, %v2371_v45  ;;  %v1998_v39 = vsel %vm1997_vm14, %v1996_v57, %v1994_v46  ;;  %v324_v46 = vmul.f32 %v2359_v40, %v2734_v62 }
 0x17c   :  { %v1651_v1 = vld.sshfl [vmem:[#allocation1 + $0x20] sm:$0xff pattern:$0x73625140]  ;;  %1665 = vst [vmem:[#allocation1 + $0x3] ss:$4 sm:$0xff] %v1152_v61  ;;  %v323_v61 = vmul.f32 %v2359_v40, %v2695_v19  ;;  %v322_v19 = vmul.f32 %v2359_v40, %v2729_v56 }
 0x17d   :  { %1656 = vst [vmem:[#allocation1 + $0x20] ss:$4 sm:$0xff] %v1124_v4  ;;  %1882 = vperm.xlu2 %2132, %v1651_v1   ;;  %v2913_v4 = vadd.s32 4294967176, %v2788_v63  ;;  %v2916_v1 = vadd.s32 4294967184, %v2788_v63 }
 0x17e   :  { %1657 = vst [vmem:[#allocation1 + $0x21] ss:$4 sm:$0xff] %v1128_v5  ;;  %v1796_v5 = vpop.permute.xlu1 %1795  ;;  %v1212_v32 = vperm.slane %v323_v61, %v2371_v45  ;;  %v1216_v27 = vperm.slane %v323_v61, %v2376_v47  ;;  %v1188_v56 = vperm.slane %v322_v19, %v2367_v43  ;;  %v1196_v30 = vperm.slane %v322_v19, %v2371_v45 }
 0x17f   :  { %1658 = vst [vmem:[#allocation1 + $0x22] ss:$4 sm:$0xff] %v1132_v13  ;;  %v1204_v13 = vperm.slane %v323_v61, %v2367_v43  ;;  %v2000_v14 = vperm.slane %v1796_v5, %v2916_v1  ;;  %v2004_v11 = vperm.slane %v1799_v52, %v2913_v4  ;;  %v1200_v55 = vperm.slane %v322_v19, %v2376_v47 }
 0x180   :  { %1659 = vst [vmem:[#allocation1 + $0x23] ss:$4 sm:$0xff] %v1136_v36  ;;  %v1208_v36 = vperm.slane %v323_v61, %v2369_v44  ;;  %v1220_v5 = vperm.slane %v324_v46, %v2367_v43 }
 0x181   :  { %v2002_v10 = vsel %vm2001_vm15, %v2000_v14, %v1998_v39  ;;  %v1224_v39 = vperm.slane %v324_v46, %v2369_v44  ;;  %v327_v14 = vmul.f32 %v2359_v40, %v2749_v12 }
 0x182   :  { %v1808_v7 = vpop.permute.xlu0 %1807 }
 0x183   :  { %v1670_v29 = vld.sshfl [vmem:[#allocation1] sm:$0xff pattern:$0x73625140]  ;;  %v2010_v61 = vperm.slane %v1808_v7, %v2805_v3  ;;  %v1280_v7 = vperm.slane %v327_v14, %v2376_v47 }
 0x184   :  { %1672 = vst [vmem:[#allocation1] ss:$4 sm:$0xff] %v1172_v48  ;;  %v2930_v48 = vsel %vm2005_vm0, %v2004_v11, %v2002_v10 }
 0x185   :  { %1891 = vperm.xlu2 %2132, %v1670_v29   ;;  %1673 = vst [vmem:[#allocation1 + $0x1] ss:$4 sm:$0xff] %v1176_v28  ;;  %v1192_v28 = vperm.slane %v322_v19, %v2369_v44 }
 0x186   :  { %1674 = vst [vmem:[#allocation1 + $0x2] ss:$4 sm:$0xff] %v1180_v21  ;;  %v1802_v21 = vpop.permute.xlu2 %1801 }
 0x187   :  { %v1661_v49 = vld.sshfl [vmem:[#allocation1 + $0x20] sm:$0xff pattern:$0x73625140]  ;;  %1675 = vst [vmem:[#allocation1 + $0x3] ss:$4 sm:$0xff] %v1184_v15  ;;  %v325_v15 = vmul.f32 %v2359_v40, %v2743_v2 }
 0x188   :  { %1666 = vst [vmem:[#allocation1 + $0x20] ss:$4 sm:$0xff] %v1156_v54  ;;  %1888 = vperm.xlu0 %2133, %v1661_v49   ;;  %v1805_v54 = vpop.permute.xlu1 %1804  ;;  %v2007_v49 = vperm.slane %v1802_v21, %v2788_v63 }
 0x189   :  { %1667 = vst [vmem:[#allocation1 + $0x21] ss:$4 sm:$0xff] %v1160_v42  ;;  %v1236_v42 = vperm.slane %v325_v15, %v2367_v43  ;;  %v2008_v51 = vperm.slane %v1805_v54, %v2797_v6  ;;  %v1244_v2 = vperm.slane %v325_v15, %v2371_v45  ;;  %v1248_v52 = vperm.slane %v325_v15, %v2376_v47 }
 0x18a   :  { %1668 = vst [vmem:[#allocation1 + $0x22] ss:$4 sm:$0xff] %v1164_v53  ;;  %v1240_v53 = vperm.slane %v325_v15, %v2369_v44  ;;  %v1817_v11 = vpop.permute.xlu0 %1816 }
 0x18b   :  { %1669 = vst [vmem:[#allocation1 + $0x23] ss:$4 sm:$0xff] %v1168_v35  ;;  %v2009_v57 = vsel %vm1949_vm2, %v2008_v51, %v2007_v49  ;;  %v2016_v12 = vperm.slane %v1817_v11, %v2835_v58 }
 0x18c   :  { %v2011_v62 = vsel %vm1953_vm3, %v2010_v61, %v2009_v57 }
 0x18e   :  { %v1680_v41 = vld.sshfl [vmem:[#allocation1] sm:$0xff pattern:$0x73625140]  ;;  %v1811_v19 = vpop.permute.xlu2 %1810 }
 0x18f   :  { %1682 = vst [vmem:[#allocation1] ss:$4 sm:$0xff] %v1204_v13 }
 0x190   :  { %1897 = vperm.xlu0 %2133, %v1680_v41   ;;  %1683 = vst [vmem:[#allocation1 + $0x1] ss:$4 sm:$0xff] %v1208_v36  ;;  %v1228_v36 = vperm.slane %v324_v46, %v2371_v45  ;;  %v1232_v41 = vperm.slane %v324_v46, %v2376_v47 }
 0x191   :  { %1684 = vst [vmem:[#allocation1 + $0x2] ss:$4 sm:$0xff] %v1212_v32  ;;  %v2012_v32 = vperm.slane %v1811_v19, %v2811_v20 }
 0x192   :  { %v1671_v29 = vld.sshfl [vmem:[#allocation1 + $0x20] sm:$0xff pattern:$0x73625140]  ;;  %1685 = vst [vmem:[#allocation1 + $0x3] ss:$4 sm:$0xff] %v1216_v27  ;;  %v1814_v27 = vpop.permute.xlu1 %1813 }
 0x193   :  { %1894 = vperm.xlu1 %2131, %v1671_v29   ;;  %1676 = vst [vmem:[#allocation1 + $0x20] ss:$4 sm:$0xff] %v1188_v56  ;;  %v2013_v10 = vsel %vm1957_vm4, %v2012_v32, %v2011_v62  ;;  %v326_v56 = vmul.f32 %v2359_v40, %v2712_v37  ;;  %v2014_v29 = vperm.slane %v1814_v27, %v2824_v50 }
 0x194   :  { %1677 = vst [vmem:[#allocation1 + $0x21] ss:$4 sm:$0xff] %v1192_v28  ;;  %v1268_v28 = vperm.slane %v327_v14, %v2367_v43 }
 0x195   :  { %1678 = vst [vmem:[#allocation1 + $0x22] ss:$4 sm:$0xff] %v1196_v30  ;;  %v1272_v30 = vperm.slane %v327_v14, %v2369_v44  ;;  %v2015_v15 = vsel %vm1961_vm5, %v2014_v29, %v2013_v10  ;;  %v1252_v54 = vperm.slane %v326_v56, %v2367_v43  ;;  %v1256_v46 = vperm.slane %v326_v56, %v2369_v44 }
 0x196   :  { %1679 = vst [vmem:[#allocation1 + $0x23] ss:$4 sm:$0xff] %v1200_v55  ;;  %v1276_v55 = vperm.slane %v327_v14, %v2371_v45  ;;  %v2017_v37 = vsel %vm1965_vm6, %v2016_v12, %v2015_v15  ;;  %v1820_v49 = vpop.permute.xlu2 %1819  ;;  %v1260_v51 = vperm.slane %v326_v56, %v2371_v45  ;;  %v331_v29 = vmul.f32 %v2359_v40, %v2771_v33 }
 0x197   :  { %v2018_v61 = vperm.slane %v1820_v49, %v2841_v9  ;;  %v330_v15 = vmul.f32 %v2359_v40, %v2763_v26 }
 0x199   :  { %v1690_v35 = vld.sshfl [vmem:[#allocation1] sm:$0xff pattern:$0x73625140] }
 0x19a   :  { %1692 = vst [vmem:[#allocation1] ss:$4 sm:$0xff] %v1236_v42  ;;  %v1823_v57 = vpop.permute.xlu1 %1822 }
 0x19b   :  { %1903 = vperm.xlu1 %2131, %v1690_v35   ;;  %1693 = vst [vmem:[#allocation1 + $0x1] ss:$4 sm:$0xff] %v1240_v53  ;;  %v1264_v53 = vperm.slane %v326_v56, %v2376_v47  ;;  %v329_v35 = vmul.f32 %v2359_v40, %v2727_v31 }
 0x19c   :  { %1694 = vst [vmem:[#allocation1 + $0x2] ss:$4 sm:$0xff] %v1244_v2  ;;  %v1826_v2 = vpop.permute.xlu0 %1825 }
 0x19d   :  { %v1681_v13 = vld.sshfl [vmem:[#allocation1 + $0x20] sm:$0xff pattern:$0x73625140]  ;;  %1695 = vst [vmem:[#allocation1 + $0x3] ss:$4 sm:$0xff] %v1248_v52  ;;  %v2019_v52 = vsel %vm1969_vm7, %v2018_v61, %v2017_v37  ;;  %v1300_v62 = vperm.slane %v329_v35, %v2367_v43  ;;  %v2022_v31 = vperm.slane %v1826_v2, %v2863_v22  ;;  %v1312_v14 = vperm.slane %v329_v35, %v2376_v47 }
 0x19e   :  { %1900 = vperm.xlu2 %2132, %v1681_v13   ;;  %1686 = vst [vmem:[#allocation1 + $0x20] ss:$4 sm:$0xff] %v1220_v5  ;;  %v328_v5 = vmul.f32 %v2359_v40, %v2756_v17  ;;  %v1304_v13 = vperm.slane %v329_v35, %v2369_v44  ;;  %v1829_v11 = vpop.permute.xlu2 %1828  ;;  %v1320_v61 = vperm.slane %v330_v15, %v2369_v44 }
 0x19f   :  { %1687 = vst [vmem:[#allocation1 + $0x21] ss:$4 sm:$0xff] %v1224_v39  ;;  %v2020_v39 = vperm.slane %v1823_v57, %v2845_v23  ;;  %v1324_v57 = vperm.slane %v330_v15, %v2371_v45 }
 0x1a0   :  { %1688 = vst [vmem:[#allocation1 + $0x22] ss:$4 sm:$0xff] %v1228_v36  ;;  %v1308_v36 = vperm.slane %v329_v35, %v2371_v45  ;;  %v1284_v17 = vperm.slane %v328_v5, %v2367_v43  ;;  %v1288_v27 = vperm.slane %v328_v5, %v2369_v44  ;;  %v1292_v56 = vperm.slane %v328_v5, %v2371_v45 }
 0x1a1   :  { %1689 = vst [vmem:[#allocation1 + $0x23] ss:$4 sm:$0xff] %v1232_v41  ;;  %v2021_v41 = vsel %vm1973_vm8, %v2020_v39, %v2019_v52  ;;  %v1316_v35 = vperm.slane %v330_v15, %v2367_v43  ;;  %v1328_v52 = vperm.slane %v330_v15, %v2376_v47  ;;  %v335_v15 = vmul.f32 %v2359_v40, %v2761_v25 }
 0x1a2   :  { %v2023_v32 = vsel %vm1977_vm9, %v2022_v31, %v2021_v41  ;;  %v1832_v12 = vpop.permute.xlu1 %1831  ;;  %v332_v31 = vmul.f32 %v2359_v40, %v2741_v60 }
 0x1a3   :  { %v2026_v37 = vperm.slane %v1832_v12, %v2876_v8  ;;  %v1400_v25 = vperm.slane %v335_v15, %v2369_v44 }
 0x1a4   :  { %v1700_v21 = vld.sshfl [vmem:[#allocation1] sm:$0xff pattern:$0x73625140]  ;;  %v1356_v12 = vperm.slane %v332_v31, %v2371_v45 }
 0x1a5   :  { %1702 = vst [vmem:[#allocation1] ss:$4 sm:$0xff] %v1268_v28  ;;  %v1296_v28 = vperm.slane %v328_v5, %v2376_v47 }
 0x1a6   :  { %1909 = vperm.xlu2 %2132, %v1700_v21   ;;  %1703 = vst [vmem:[#allocation1 + $0x1] ss:$4 sm:$0xff] %v1272_v30  ;;  %v2024_v30 = vperm.slane %v1829_v11, %v2859_v34  ;;  %v1835_v21 = vpop.permute.xlu0 %1834 }
 0x1a7   :  { %1704 = vst [vmem:[#allocation1 + $0x2] ss:$4 sm:$0xff] %v1276_v55  ;;  %v2028_v33 = vperm.slane %v1835_v21, %v2889_v18 }
 0x1a8   :  { %1705 = vst [vmem:[#allocation1 + $0x3] ss:$4 sm:$0xff] %v1280_v7  ;;  %v1691_v42 = vld.sshfl [vmem:[#allocation1 + $0x20] sm:$0xff pattern:$0x73625140]  ;;  %v2025_v55 = vsel %vm1981_vm10, %v2024_v30, %v2023_v32  ;;  %v1332_v7 = vperm.slane %v331_v29, %v2367_v43 }
 0x1a9   :  { %1906 = vperm.xlu0 %2133, %v1691_v42   ;;  %1696 = vst [vmem:[#allocation1 + $0x20] ss:$4 sm:$0xff] %v1252_v54  ;;  %v1336_v54 = vperm.slane %v331_v29, %v2369_v44  ;;  %v1340_v42 = vperm.slane %v331_v29, %v2371_v45  ;;  %v2027_v49 = vsel %vm1985_vm11, %v2026_v37, %v2025_v55 }
 0x1aa   :  { %1697 = vst [vmem:[#allocation1 + $0x21] ss:$4 sm:$0xff] %v1256_v46  ;;  %v2029_v26 = vsel %vm1989_vm12, %v2028_v33, %v2027_v49  ;;  %v1360_v55 = vperm.slane %v332_v31, %v2376_v47  ;;  %v334_v49 = vmul.f32 %v2359_v40, %v2784_v59 }
 0x1ab   :  { %1698 = vst [vmem:[#allocation1 + $0x22] ss:$4 sm:$0xff] %v1260_v51  ;;  %v1344_v51 = vperm.slane %v331_v29, %v2376_v47 }
 0x1ac   :  { %1699 = vst [vmem:[#allocation1 + $0x23] ss:$4 sm:$0xff] %v1264_v53  ;;  %v1838_v53 = vpop.permute.xlu2 %1837  ;;  %v1392_v59 = vperm.slane %v334_v49, %v2376_v47 }
 0x1ad   :  { %v2030_v5 = vperm.slane %v1838_v53, %v2886_v16  ;;  %v1404_v53 = vperm.slane %v335_v15, %v2371_v45 }
 0x1ae   :  { %v1844_v39 = vpop.permute.xlu0 %1843 }
 0x1af   :  { %v1710_v19 = vld.sshfl [vmem:[#allocation1] sm:$0xff pattern:$0x73625140] }
 0x1b0   :  { %1712 = vst [vmem:[#allocation1] ss:$4 sm:$0xff] %v1300_v62  ;;  %v333_v62 = vmul.f32 %v2359_v40, %v2776_v24  ;;  %v2034_v24 = vperm.slane %v1844_v39, %v2916_v1 }
 0x1b1   :  { %1915 = vperm.xlu0 %2133, %v1710_v19   ;;  %1713 = vst [vmem:[#allocation1 + $0x1] ss:$4 sm:$0xff] %v1304_v13  ;;  %v1841_v13 = vpop.permute.xlu1 %1840  ;;  %v2031_v19 = vsel %vm1993_vm13, %v2030_v5, %v2029_v26  ;;  %v1408_v26 = vperm.slane %v335_v15, %v2376_v47 }
 0x1b2   :  { %1714 = vst [vmem:[#allocation1 + $0x2] ss:$4 sm:$0xff] %v1308_v36  ;;  %v1364_v36 = vperm.slane %v333_v62, %v2367_v43  ;;  %v2032_v41 = vperm.slane %v1841_v13, %v2903_v38 }
 0x1b3   :  { %v1701_v10 = vld.sshfl [vmem:[#allocation1 + $0x20] sm:$0xff pattern:$0x73625140]  ;;  %1715 = vst [vmem:[#allocation1 + $0x3] ss:$4 sm:$0xff] %v1312_v14  ;;  %v1368_v14 = vperm.slane %v333_v62, %v2369_v44 }
 0x1b4   :  { %1912 = vperm.xlu1 %2131, %v1701_v10   ;;  %1706 = vst [vmem:[#allocation1 + $0x20] ss:$4 sm:$0xff] %v1284_v17  ;;  %v1372_v17 = vperm.slane %v333_v62, %v2371_v45  ;;  %v1847_v11 = vpop.permute.xlu2 %1846  ;;  %v1376_v10 = vperm.slane %v333_v62, %v2376_v47 }
 0x1b5   :  { %1707 = vst [vmem:[#allocation1 + $0x21] ss:$4 sm:$0xff] %v1288_v27  ;;  %v2033_v27 = vsel %vm1997_vm14, %v2032_v41, %v2031_v19  ;;  %v2036_v30 = vperm.slane %v1847_v11, %v2913_v4 }
 0x1b6   :  { %1708 = vst [vmem:[#allocation1 + $0x22] ss:$4 sm:$0xff] %v1292_v56  ;;  %v2035_v60 = vsel %vm2001_vm15, %v2034_v24, %v2033_v27  ;;  %v1348_v56 = vperm.slane %v332_v31, %v2367_v43 }
 0x1b7   :  { %1709 = vst [vmem:[#allocation1 + $0x23] ss:$4 sm:$0xff] %v1296_v28  ;;  %v1352_v28 = vperm.slane %v332_v31, %v2369_v44  ;;  %v3028_v37 = vsel %vm2005_vm0, %v2036_v30, %v2035_v60 }
 0x1b8   :  { %v1853_v21 = vpop.permute.xlu0 %1852 }
 0x1ba   :  { %v1720_v46 = vld.sshfl [vmem:[#allocation1] sm:$0xff pattern:$0x73625140] }
 0x1bb   :  { %1722 = vst [vmem:[#allocation1] ss:$4 sm:$0xff] %v1332_v7  ;;  %v1850_v7 = vpop.permute.xlu1 %1849 }
 0x1bc   :  { %1921 = vperm.xlu1 %2131, %v1720_v46   ;;  %1723 = vst [vmem:[#allocation1 + $0x1] ss:$4 sm:$0xff] %v1336_v54  ;;  %v2039_v54 = vperm.slane %v1853_v21, %v2797_v6  ;;  %v2038_v46 = vperm.slane %v1850_v7, %v2788_v63  ;;  %v1856_v62 = vpop.permute.xlu2 %1855 }
 0x1bd   :  { %1724 = vst [vmem:[#allocation1 + $0x2] ss:$4 sm:$0xff] %v1340_v42  ;;  %v1396_v42 = vperm.slane %v335_v15, %v2367_v43 }
 0x1be   :  { %v1711_v2 = vld.sshfl [vmem:[#allocation1 + $0x20] sm:$0xff pattern:$0x73625140]  ;;  %1725 = vst [vmem:[#allocation1 + $0x3] ss:$4 sm:$0xff] %v1344_v51  ;;  %v2040_v33 = vsel %vm1949_vm2, %v2039_v54, %v2038_v46 }
 0x1bf   :  { %1918 = vperm.xlu2 %2132, %v1711_v2   ;;  %1716 = vst [vmem:[#allocation1 + $0x20] ss:$4 sm:$0xff] %v1316_v35  ;;  %v1380_v35 = vperm.slane %v334_v49, %v2367_v43 }
 0x1c0   :  { %1717 = vst [vmem:[#allocation1 + $0x21] ss:$4 sm:$0xff] %v1320_v61  ;;  %v1384_v61 = vperm.slane %v334_v49, %v2369_v44 }
 0x1c1   :  { %1718 = vst [vmem:[#allocation1 + $0x22] ss:$4 sm:$0xff] %v1324_v57  ;;  %v1388_v57 = vperm.slane %v334_v49, %v2371_v45 }
 0x1c2   :  { %1719 = vst [vmem:[#allocation1 + $0x23] ss:$4 sm:$0xff] %v1328_v52  ;;  %v336_v52 = vmul.f32 %v2359_v40, %v2791_v0 }
 0x1c3   :  { %v1859_v13 = vpop.permute.xlu1 %1858 }
 0x1c4   :  { %v1412_v39 = vperm.slane %v336_v52, %v2367_v43  ;;  %v1416_v19 = vperm.slane %v336_v52, %v2369_v44  ;;  %v1424_v41 = vperm.slane %v336_v52, %v2376_v47  ;;  %v1865_v40 = vpop.permute.xlu2 %1864  ;;  %v2043_v24 = vperm.slane %v1859_v13, %v2811_v20 }
 0x1c5   :  { %v1730_v32 = vld.sshfl [vmem:[#allocation1] sm:$0xff pattern:$0x73625140]  ;;  %v2041_v43 = vperm.slane %v1856_v62, %v2805_v3  ;;  %v2047_v60 = vperm.slane %v1865_v40, %v2835_v58 }
 0x1c6   :  { %1732 = vst [vmem:[#allocation1] ss:$4 sm:$0xff] %v1364_v36  ;;  %v1420_v36 = vperm.slane %v336_v52, %v2371_v45 }
 0x1c7   :  { %1927 = vperm.xlu2 %2132, %v1730_v32   ;;  %1733 = vst [vmem:[#allocation1 + $0x1] ss:$4 sm:$0xff] %v1368_v14  ;;  %v1862_v14 = vpop.permute.xlu0 %1861 }
 0x1c8   :  { %1734 = vst [vmem:[#allocation1 + $0x2] ss:$4 sm:$0xff] %v1372_v17  ;;  %v2042_v17 = vsel %vm1953_vm3, %v2041_v43, %v2040_v33  ;;  %v2045_v47 = vperm.slane %v1862_v14, %v2824_v50 }
 0x1c9   :  { %1735 = vst [vmem:[#allocation1 + $0x3] ss:$4 sm:$0xff] %v1376_v10  ;;  %v1721_v29 = vld.sshfl [vmem:[#allocation1 + $0x20] sm:$0xff pattern:$0x73625140]  ;;  %v2044_v45 = vsel %vm1957_vm4, %v2043_v24, %v2042_v17 }
 0x1ca   :  { %1924 = vperm.xlu0 %2133, %v1721_v29   ;;  %1726 = vst [vmem:[#allocation1 + $0x20] ss:$4 sm:$0xff] %v1348_v56  ;;  %v2046_v27 = vsel %vm1961_vm5, %v2045_v47, %v2044_v45 }
 0x1cb   :  { %1727 = vst [vmem:[#allocation1 + $0x21] ss:$4 sm:$0xff] %v1352_v28  ;;  %v1868_v0 = vpop.permute.xlu1 %1867  ;;  %v2048_v28 = vsel %vm1965_vm6, %v2047_v60, %v2046_v27 }
 0x1cc   :  { %1728 = vst [vmem:[#allocation1 + $0x22] ss:$4 sm:$0xff] %v1356_v12  ;;  %v1874_v11 = vpop.permute.xlu2 %1873  ;;  %v2049_v10 = vperm.slane %v1868_v0, %v2841_v9 }
 0x1cd   :  { %1729 = vst [vmem:[#allocation1 + $0x23] ss:$4 sm:$0xff] %v1360_v55  ;;  %v2053_v7 = vperm.slane %v1874_v11, %v2863_v22 }
 0x1ce   :  { %v2050_v29 = vsel %vm1969_vm7, %v2049_v10, %v2048_v28 }
 0x1d0   :  { %v1740_v51 = vld.sshfl [vmem:[#allocation1] sm:$0xff pattern:$0x73625140] }
 0x1d1   :  { %1742 = vst [vmem:[#allocation1] ss:$4 sm:$0xff] %v1396_v42 }
 0x1d2   :  { %1933 = vperm.xlu0 %2133, %v1740_v51   ;;  %1743 = vst [vmem:[#allocation1 + $0x1] ss:$4 sm:$0xff] %v1400_v25 }
 0x1d3   :  { %1744 = vst [vmem:[#allocation1 + $0x2] ss:$4 sm:$0xff] %v1404_v53 }
 0x1d4   :  { %v1731_v2 = vld.sshfl [vmem:[#allocation1 + $0x20] sm:$0xff pattern:$0x73625140]  ;;  %1745 = vst [vmem:[#allocation1 + $0x3] ss:$4 sm:$0xff] %v1408_v26 }
 0x1d5   :  { %1930 = vperm.xlu1 %2131, %v1731_v2   ;;  %1736 = vst [vmem:[#allocation1 + $0x20] ss:$4 sm:$0xff] %v1380_v35 }
 0x1d6   :  { %1737 = vst [vmem:[#allocation1 + $0x21] ss:$4 sm:$0xff] %v1384_v61 }
 0x1d7   :  { %1738 = vst [vmem:[#allocation1 + $0x22] ss:$4 sm:$0xff] %v1388_v57  ;;  %v1883_v55 = vpop.permute.xlu2 %1882 }
 0x1d8   :  { %1739 = vst [vmem:[#allocation1 + $0x23] ss:$4 sm:$0xff] %v1392_v59  ;;  %v2059_v53 = vperm.slane %v1883_v55, %v2889_v18 }
 0x1d9   :  { %v1871_v44 = vpop.permute.xlu0 %1870 }
 0x1da   :  { %v2051_v21 = vperm.slane %v1871_v44, %v2845_v23 }
 0x1db   :  { %v1750_v5 = vld.sshfl [vmem:[#allocation1] sm:$0xff pattern:$0x73625140] }
 0x1dc   :  { %v2052_v12 = vsel %vm1973_vm8, %v2051_v21, %v2050_v29 }
 0x1dd   :  { %1939 = vperm.xlu1 %2131, %v1750_v5   ;;  %v2054_v54 = vsel %vm1977_vm9, %v2053_v7, %v2052_v12 }
 0x1df   :  { %v1741_v31 = vld.sshfl [vmem:[#allocation1 + $0x20] sm:$0xff pattern:$0x73625140]  ;;  %v1892_v35 = vpop.permute.xlu2 %1891 }
 0x1e0   :  { %1936 = vperm.xlu2 %2132, %v1741_v31   ;;  %1746 = vst [vmem:[#allocation1 + $0x20] ss:$4 sm:$0xff] %v1412_v39  ;;  %v2065_v59 = vperm.slane %v1892_v35, %v2916_v1 }
 0x1e1   :  { %1747 = vst [vmem:[#allocation1 + $0x21] ss:$4 sm:$0xff] %v1416_v19  ;;  %v1880_v30 = vpop.permute.xlu0 %1879 }
 0x1e2   :  { %1748 = vst [vmem:[#allocation1 + $0x22] ss:$4 sm:$0xff] %v1420_v36  ;;  %v2057_v42 = vperm.slane %v1880_v30, %v2876_v8 }
 0x1e3   :  { %1749 = vst [vmem:[#allocation1 + $0x23] ss:$4 sm:$0xff] %v1424_v41 }
 0x1e4   :  { %v1877_v56 = vpop.permute.xlu1 %1876 }
 0x1e5   :  { %v2055_v15 = vperm.slane %v1877_v56, %v2859_v34 }
 0x1e7   :  { %v2056_v46 = vsel %vm1981_vm10, %v2055_v15, %v2054_v54 }
 0x1e8   :  { %v2058_v25 = vsel %vm1985_vm11, %v2057_v42, %v2056_v46 }
 0x1e9   :  { %v2060_v61 = vsel %vm1989_vm12, %v2059_v53, %v2058_v25 }
 0x1ea   :  { %v1751_v32 = vld.sshfl [vmem:[#allocation1 + $0x20] sm:$0xff pattern:$0x73625140] }
 0x1eb   :  { %1942 = vperm.xlu0 %2133, %v1751_v32  }
 0x1ec   :  { %v1886_v33 = vpop.permute.xlu1 %1885 }
 0x1ed   :  { %v2061_v51 = vperm.slane %v1886_v33, %v2886_v16 }
 0x1ef   :  { %v2062_v2 = vsel %vm1993_vm13, %v2061_v51, %v2060_v61 }
 0x1f8   :  { %v1901_v36 = vpop.permute.xlu2 %1900 }
 0x1f9   :  { %v2070_v43 = vperm.slane %v1901_v36, %v2797_v6 }
 0x1fa   :  { %v1889_v49 = vpop.permute.xlu0 %1888 }
 0x1fb   :  { %v2063_v26 = vperm.slane %v1889_v49, %v2903_v38 }
 0x1fd   :  { %v2064_v57 = vsel %vm1997_vm14, %v2063_v26, %v2062_v2 }
 0x1fe   :  { %v2066_v5 = vsel %vm2001_vm15, %v2065_v59, %v2064_v57 }
 0x200   :  { %v1910_v40 = vpop.permute.xlu2 %1909 }
 0x201   :  { %v2076_v10 = vperm.slane %v1910_v40, %v2824_v50 }
 0x202   :  { %v1898_v19 = vpop.permute.xlu0 %1897 }
 0x203   :  { %v2069_v0 = vperm.slane %v1898_v19, %v2788_v63 }
 0x205   :  { %v1895_v52 = vpop.permute.xlu1 %1894  ;;  %v2071_v17 = vsel %vm1949_vm2, %v2070_v43, %v2069_v0  ;;  %vm2104_vm2 = vcmask 1041408  }
 0x206   :  { %v2067_v62 = vperm.slane %v1895_v52, %v2913_v4 }
 0x208   :  { %v2068_v39 = vsel %vm2005_vm0, %v2067_v62, %v2066_v5 }
 0x209   :  { %v2101_v13 = vsel %vm2100_vm1, %v2068_v39, %v2930_v48 }
 0x20d   :  { %v1904_v31 = vpop.permute.xlu1 %1903 }
 0x20e   :  { %v2072_v24 = vperm.slane %v1904_v31, %v2805_v3 }
 0x210   :  { %v2073_v48 = vsel %vm1953_vm3, %v2072_v24, %v2071_v17 }
 0x219   :  { %v1919_v11 = vpop.permute.xlu2 %1918 }
 0x21a   :  { %v2082_v29 = vperm.slane %v1919_v11, %v2845_v23 }
 0x21b   :  { %v1907_v41 = vpop.permute.xlu0 %1906 }
 0x21c   :  { %v2074_v44 = vperm.slane %v1907_v41, %v2811_v20 }
 0x21e   :  { %v2075_v47 = vsel %vm1957_vm4, %v2074_v44, %v2073_v48 }
 0x21f   :  { %v2077_v60 = vsel %vm1961_vm5, %v2076_v10, %v2075_v47 }
 0x221   :  { %v1928_v21 = vpop.permute.xlu2 %1927 }
 0x222   :  { %v2088_v15 = vperm.slane %v1928_v21, %v2876_v8 }
 0x223   :  { %v1916_v32 = vpop.permute.xlu0 %1915 }
 0x224   :  { %v2080_v3 = vperm.slane %v1916_v32, %v2841_v9 }
 0x226   :  { %v1913_v14 = vpop.permute.xlu1 %1912 }
 0x227   :  { %v2078_v27 = vperm.slane %v1913_v14, %v2835_v58 }
 0x229   :  { %v2079_v6 = vsel %vm1965_vm6, %v2078_v27, %v2077_v60 }
 0x22a   :  { %v2081_v56 = vsel %vm1969_vm7, %v2080_v3, %v2079_v6 }
 0x22b   :  { %v2083_v58 = vsel %vm1973_vm8, %v2082_v29, %v2081_v56 }
 0x22e   :  { %v1922_v45 = vpop.permute.xlu1 %1921 }
 0x22f   :  { %v2084_v28 = vperm.slane %v1922_v45, %v2863_v22 }
 0x231   :  { %v2085_v50 = vsel %vm1977_vm9, %v2084_v28, %v2083_v58 }
 0x23c   :  { %v1925_v63 = vpop.permute.xlu0 %1924 }
 0x23d   :  { %v2086_v30 = vperm.slane %v1925_v63, %v2859_v34  ;;  %v1937_v34 = vpop.permute.xlu2 %1936 }
 0x23e   :  { %v2094_v42 = vperm.slane %v1937_v34, %v2903_v38 }
 0x23f   :  { %v2087_v12 = vsel %vm1981_vm10, %v2086_v30, %v2085_v50 }
 0x240   :  { %v2089_v7 = vsel %vm1985_vm11, %v2088_v15, %v2087_v12 }
 0x244   :  { %v1934_v55 = vpop.permute.xlu0 %1933 }
 0x245   :  { %v2092_v22 = vperm.slane %v1934_v55, %v2886_v16 }
 0x247   :  { %v1931_v20 = vpop.permute.xlu1 %1930 }
 0x248   :  { %v2090_v9 = vperm.slane %v1931_v20, %v2889_v18 }
 0x24a   :  { %v2091_v23 = vsel %vm1989_vm12, %v2090_v9, %v2089_v7 }
 0x24b   :  { %v2093_v46 = vsel %vm1993_vm13, %v2092_v22, %v2091_v23 }
 0x24c   :  { %v2095_v18 = vsel %vm1997_vm14, %v2094_v42, %v2093_v46 }
 0x24f   :  { %v1940_v54 = vpop.permute.xlu1 %1939 }
 0x250   :  { %v2096_v33 = vperm.slane %v1940_v54, %v2916_v1 }
 0x252   :  { %v2097_v8 = vsel %vm2001_vm15, %v2096_v33, %v2095_v18 }
 0x25d   :  { %v1943_v49 = vpop.permute.xlu0 %1942 }
 0x25e   :  { %v2098_v25 = vperm.slane %v1943_v49, %v2913_v4 }
 0x260   :  { %v2099_v51 = vsel %vm2005_vm0, %v2098_v25, %v2097_v8 }
 0x261   :  { %v2102_v16 = vsel %vm2100_vm1, %v2099_v51, %v3028_v37 }
 0x262   :  { %v2103_v38 = vrot.slane %v2102_v16, 6 }
 0x264   :  { %v2105_v1 = vsel %vm2104_vm2, %v2101_v13, %v2103_v38 }
 0x265   :  { %2107 = vst [vmem:[#allocation2] sm:$0xf] %v2105_v1 }
 0x266   :  { %2118 = dma.vmem_to_hbm [thread:$0]  %s2114_s18, 64, %s2116_s21, [#allocation3]  }
 0x267   :  { %2160 = dma.done.wait [#allocation3], 64  }
 0x268   :  { %2161 = vsyncadd [#allocation3], 4294967232 }
 0x269   :  { %2123 = vsyncpa [#allocation3], 1 }

</bundles_post_ra>
